<compile_context>
chip_gen: v7x
topology: tpu7x:2x2x1
jax: 0.10.0
libtpu: 0.0.40
codegen_flags: <defaults>
</compile_context>

<pallas_src>
import functools

import jax
import jax.numpy as jnp
from jax import lax
from jax.experimental import pallas as pl
from jax.experimental.pallas import tpu as pltpu


# ------------------------------- kernel --------------------------------------

def _sclstm_fused_kernel(xd_ref, w_ref, wh_ref, b_ref, post_ref, shift_ref,
                         h0_ref, c0_ref, hc_out_ref, pre_scr, dw_scr):
    bs, hs = h0_ref.shape
    t_len = xd_ref.shape[0] // bs
    mm_dtype = w_ref.dtype

    # ---- Prologue (fully parallel over T): one batched M = T*B MXU matmul ----
    #   [x || d] @ [[wx*pre, 0], [0, wd]] + [b*pre | 0]  ->  [gate_pre | d@wd]
    lin_x = jnp.dot(xd_ref[...], w_ref[...],
                    preferred_element_type=jnp.float32) + b_ref[...]   # (T*B, 5H)
    pre_scr[...] = lin_x[:, :4 * hs]                 # gate pre-activations
    dw_scr[...] = jnp.tanh(lin_x[:, 4 * hs:])        # tanh(d @ wd), hoisted

    # ---- Recurrence over T: VMEM-resident, no per-step grid/DMA overhead ----
    wh = wh_ref[...]                                          # (H, 4H), resident
    post = jnp.broadcast_to(post_ref[...], (bs, 4 * hs))      # hoisted broadcasts
    shift = jnp.broadcast_to(shift_ref[...], (bs, 4 * hs))

    def step(t, carry):
        h, c = carry
        row = pl.multiple_of(t * bs, bs)
        pre_t = pre_scr[pl.ds(row, bs), :]                    # (B, 4H) lane-dense
        dw_t = dw_scr[pl.ds(row, bs), :]                      # (B, H)
        lin = pre_t + jnp.dot(h.astype(mm_dtype), wh,
                              preferred_element_type=jnp.float32)
        # sigmoid(x) = 0.5*tanh(0.5x)+0.5 (0.5 pre-scale folded into weights)
        # -> a single tanh over the full (B,4H) row + per-column affine.
        act = jnp.tanh(lin) * post + shift
        i_t = act[:, 0 * hs:1 * hs]
        f_t = act[:, 1 * hs:2 * hs]
        g_t = act[:, 2 * hs:3 * hs]
        o_t = act[:, 3 * hs:4 * hs]
        c_new = f_t * c + i_t * g_t + dw_t
        h_new = o_t * jnp.tanh(c_new)
        hc_out_ref[pl.ds(row, bs), :] = jnp.concatenate(
            [h_new, c_new], axis=-1).astype(hc_out_ref.dtype)
        return h_new, c_new

    lax.fori_loop(0, t_len, step,
                  (h0_ref[...].astype(jnp.float32),
                   c0_ref[...].astype(jnp.float32)),
                  unroll=True)


# ------------------------------ param packing --------------------------------

def _pack_params(weight, bias, wd, input_size, hidden_size, mm_dtype):
    """Block-pack parameters; fold the exact 0.5 sigmoid pre-scale into them."""
    hs, in_sz = hidden_size, input_size
    v = wd.shape[0]
    f32 = jnp.float32

    wx = weight[:in_sz].astype(f32)          # (In, 4H)
    wh = weight[in_sz:].astype(f32)          # (H,  4H)

    # Gates (i, f, g, o): sigmoid for i/f/o -> pre-scale 0.5 (exact), tanh g -> 1.
    pre = jnp.concatenate([jnp.full((2 * hs,), 0.5, f32),
                           jnp.full((hs,), 1.0, f32),
                           jnp.full((hs,), 0.5, f32)])              # (4H,)

    # Block-pack:  [x | d] @ [[wx*pre, 0], [0, wd]] = [gate_pre | d@wd]
    w_big = jnp.zeros((in_sz + v, 5 * hs), f32)
    w_big = w_big.at[:in_sz, :4 * hs].set(wx * pre[None, :])
    w_big = w_big.at[in_sz:, 4 * hs:].set(wd.astype(f32))
    wh_big = wh * pre[None, :]                                      # (H, 4H)
    b_big = jnp.concatenate([bias.astype(f32) * pre,
                             jnp.zeros((hs,), f32)]).reshape(1, 5 * hs)

    # act = post * tanh(pre * lin) + shift  (sigmoid cols: 0.5,0.5 / tanh: 1,0)
    post = jnp.concatenate([jnp.full((2 * hs,), 0.5, f32),
                            jnp.full((hs,), 1.0, f32),
                            jnp.full((hs,), 0.5, f32)]).reshape(1, 4 * hs)
    shift = jnp.concatenate([jnp.full((2 * hs,), 0.5, f32),
                             jnp.full((hs,), 0.0, f32),
                             jnp.full((hs,), 0.5, f32)]).reshape(1, 4 * hs)

    # Matmul operands optionally bf16 (v6e/v7x MXU); bias/post/shift stay f32
    # since they are applied after the f32 accumulation.
    return w_big.astype(mm_dtype), wh_big.astype(mm_dtype), b_big, post, shift


# -------------------------------- wrappers ------------------------------------

def sclstm_seq(x_seq, d_seq, h0, c0, weight, bias, wd, *, use_bf16_matmul=False):
    """Fused T-step SCLSTM. Returns (h_seq, c_seq) of shape (T, B, H)."""
    t_len, bs, in_sz = x_seq.shape
    hs = h0.shape[-1]
    v = d_seq.shape[-1]
    out_dtype = x_seq.dtype
    mm_dtype = jnp.bfloat16 if use_bf16_matmul else jnp.float32

    w_big, wh_big, b_big, post, shift = _pack_params(
        weight, bias, wd, in_sz, hs, mm_dtype)

    # One-time wrapper concat + flatten of the streamed inputs: (T*B, In+V).
    xd = jnp.concatenate([x_seq, d_seq], axis=-1).reshape(t_len * bs, in_sz + v)
    xd = xd.astype(mm_dtype)

    full = lambda shape: pl.BlockSpec(shape, lambda i, _s=len(shape): (0,) * _s)

    hc = pl.pallas_call(
        _sclstm_fused_kernel,
        out_shape=jax.ShapeDtypeStruct((t_len * bs, 2 * hs), out_dtype),
        grid=(1,),                                    # single invocation; whole
        in_specs=[                                    # problem VMEM-resident
            full(xd.shape),                           # (T*B, In+V)
            full(w_big.shape),                        # (In+V, 5H)
            full(wh_big.shape),                       # (H, 4H)
            full(b_big.shape),                        # (1, 5H)
            full(post.shape),                         # (1, 4H)
            full(shift.shape),                        # (1, 4H)
            full((bs, hs)),                           # h0
            full((bs, hs)),                           # c0
        ],
        out_specs=full((t_len * bs, 2 * hs)),         # packed [h | c] slab
        scratch_shapes=[pltpu.VMEM((t_len * bs, 4 * hs), jnp.float32),  # gate pre
                        pltpu.VMEM((t_len * bs, hs), jnp.float32)],     # tanh(d@wd)
        compiler_params=pltpu.CompilerParams(
            dimension_semantics=("arbitrary",)),
    )(xd, w_big, wh_big, b_big, post, shift,
      h0.astype(jnp.float32), c0.astype(jnp.float32))

    h_seq = hc[:, :hs].reshape(t_len, bs, hs)
    c_seq = hc[:, hs:].reshape(t_len, bs, hs)
    return h_seq, c_seq


def sclstm_cell(x, h_c, d, weight, bias, wd, *, use_bf16_matmul=False):
    """Module-equivalent single step: returns (h_new, c_new)."""
    h_t, c_t = h_c
    h_seq, c_seq = sclstm_seq(x[None], d[None], h_t, c_t, weight, bias, wd,
                              use_bf16_matmul=use_bf16_matmul)
    return h_seq[0], c_seq[0]


# ----------------------------- pure-JAX references ---------------------------

def sclstm_ref_step(h, c, x, d, weight, bias, wd):
    """Mirrors the PyTorch forward exactly."""
    hs = h.shape[-1]
    x_h = jnp.concatenate([x, h], axis=-1)
    lin = x_h @ weight + bias
    i_t = jax.nn.sigmoid(lin[:, :hs])
    f_t = jax.nn.sigmoid(lin[:, hs:2 * hs])
    g_t = jnp.tanh(lin[:, 2 * hs:3 * hs])
    o_t = jax.nn.sigmoid(lin[:, 3 * hs:])
    c_new = f_t * c + i_t * g_t + jnp.tanh(d @ wd)
    h_new = o_t * jnp.tanh(c_new)
    return h_new, c_new


def sclstm_seq_ref(x_seq, d_seq, h0, c0, weight, bias, wd):
    def step(carry, xd):
        h, c = carry
        x, d = xd
        h2, c2 = sclstm_ref_step(h, c, x, d, weight, bias, wd)
        return (h2, c2), (h2, c2)
    _, (h_seq, c_seq) = jax.lax.scan(step, (h0, c0), (x_seq, d_seq))
    return h_seq, c_seq


if __name__ == "__main__":
    batch = 8
    input_size = 32
    hidden_size = 32
    kwd_vocab_sz = 16
    seq_len = 16
    dtype = jnp.float32

    key = jax.random.PRNGKey(0)
    k_x, k_h, k_c, k_d, k_w, k_b, k_wd = jax.random.split(key, 7)

    x_seq = jax.random.normal(k_x, (seq_len, batch, input_size), dtype)
    d_seq = jax.random.uniform(k_d, (seq_len, batch, kwd_vocab_sz), dtype)
    h0 = jax.random.normal(k_h, (batch, hidden_size), dtype)
    c0 = jax.random.normal(k_c, (batch, hidden_size), dtype)

    weight = 0.1 * jax.random.normal(
        k_w, (input_size + hidden_size, hidden_size * 4), dtype)
    bias = 0.1 * jax.random.normal(k_b, (hidden_size * 4,), dtype)
    wd = 0.1 * jax.random.normal(k_wd, (kwd_vocab_sz, hidden_size), dtype)

    h_ref_seq, c_ref_seq = sclstm_seq_ref(x_seq, d_seq, h0, c0, weight, bias, wd)

    # Fused sequence kernel, f32 matmul operands (tight check).
    h_seq, c_seq = jax.jit(sclstm_seq)(x_seq, d_seq, h0, c0, weight, bias, wd)
    jax.block_until_ready((h_seq, c_seq))
    assert jnp.allclose(h_seq, h_ref_seq, atol=1e-4, rtol=1e-4), (
        "h_seq mismatch, max err %e" % float(jnp.max(jnp.abs(h_seq - h_ref_seq))))
    assert jnp.allclose(c_seq, c_ref_seq, atol=1e-4, rtol=1e-4), (
        "c_seq mismatch, max err %e" % float(jnp.max(jnp.abs(c_seq - c_ref_seq))))

    # bf16 MXU operands (v6e/v7x fast path); elementwise math stays f32.
    seq_bf16 = jax.jit(functools.partial(sclstm_seq, use_bf16_matmul=True))
    h_seq_b, c_seq_b = seq_bf16(x_seq, d_seq, h0, c0, weight, bias, wd)
    jax.block_until_ready((h_seq_b, c_seq_b))
    assert jnp.allclose(h_seq_b, h_ref_seq, atol=3e-2, rtol=3e-2), (
        "bf16 h_seq mismatch, max err %e"
        % float(jnp.max(jnp.abs(h_seq_b - h_ref_seq))))
    assert jnp.allclose(c_seq_b, c_ref_seq, atol=3e-2, rtol=3e-2), (
        "bf16 c_seq mismatch, max err %e"
        % float(jnp.max(jnp.abs(c_seq_b - c_ref_seq))))

    # Single-step entry point (exact module forward semantics).
    h1, c1 = jax.jit(sclstm_cell)(x_seq[0], (h0, c0), d_seq[0], weight, bias, wd)
    jax.block_until_ready((h1, c1))
    h1_ref, c1_ref = sclstm_ref_step(h0, c0, x_seq[0], d_seq[0], weight, bias, wd)
    assert jnp.allclose(h1, h1_ref, atol=1e-4, rtol=1e-4)
    assert jnp.allclose(c1, c1_ref, atol=1e-4, rtol=1e-4)

    print("KERNEL_OK")
</pallas_src>

<mosaic_0001>
module attributes {stable_mosaic.version = 11 : i64} {
  func.func @_sclstm_fused_kernel(%arg0: i32, %arg1: memref<128x48xf32, #tpu.memory_space<vmem>>, %arg2: memref<48x160xf32, #tpu.memory_space<vmem>>, %arg3: memref<32x128xf32, #tpu.memory_space<vmem>>, %arg4: memref<1x160xf32, #tpu.memory_space<vmem>>, %arg5: memref<1x128xf32, #tpu.memory_space<vmem>>, %arg6: memref<1x128xf32, #tpu.memory_space<vmem>>, %arg7: memref<8x32xf32, #tpu.memory_space<vmem>>, %arg8: memref<8x32xf32, #tpu.memory_space<vmem>>, %arg9: memref<128x64xf32, #tpu.memory_space<vmem>>, %arg10: memref<128x128xf32, #tpu.memory_space<vmem>>, %arg11: memref<128x32xf32, #tpu.memory_space<vmem>>) attributes {dimension_semantics = [#tpu.dimension_semantics<arbitrary>], iteration_bounds = array<i64: 1>, scalar_prefetch = 0 : i64, scratch_operands = 2 : i64, tpu.core_type = #tpu.core_type<tc>, window_params = [{pipeline_mode = #tpu.pipeline_mode<synchronous>, transform_indices = @transform_0, window_bounds = array<i64: 128, 48>}, {pipeline_mode = #tpu.pipeline_mode<synchronous>, transform_indices = @transform_1, window_bounds = array<i64: 48, 160>}, {pipeline_mode = #tpu.pipeline_mode<synchronous>, transform_indices = @transform_2, window_bounds = array<i64: 32, 128>}, {pipeline_mode = #tpu.pipeline_mode<synchronous>, transform_indices = @transform_3, window_bounds = array<i64: 1, 160>}, {pipeline_mode = #tpu.pipeline_mode<synchronous>, transform_indices = @transform_4, window_bounds = array<i64: 1, 128>}, {pipeline_mode = #tpu.pipeline_mode<synchronous>, transform_indices = @transform_5, window_bounds = array<i64: 1, 128>}, {pipeline_mode = #tpu.pipeline_mode<synchronous>, transform_indices = @transform_6, window_bounds = array<i64: 8, 32>}, {pipeline_mode = #tpu.pipeline_mode<synchronous>, transform_indices = @transform_7, window_bounds = array<i64: 8, 32>}, {pipeline_mode = #tpu.pipeline_mode<synchronous>, transform_indices = @transform_8, window_bounds = array<i64: 128, 64>}]} {
    %c0 = arith.constant 0 : index
    %c0_0 = arith.constant 0 : index
    %0 = vector.load %arg1[%c0, %c0_0] : memref<128x48xf32, #tpu.memory_space<vmem>>, vector<128x48xf32>
    %c0_1 = arith.constant 0 : index
    %c0_2 = arith.constant 0 : index
    %1 = vector.load %arg2[%c0_1, %c0_2] : memref<48x160xf32, #tpu.memory_space<vmem>>, vector<48x160xf32>
    %cst = arith.constant dense<0.000000e+00> : vector<128x160xf32>
    %2 = tpu.matmul %0, %1, %cst {dimension_numbers = #tpu.dot_dimension_numbers<[1], [0], [0], [1], [0, 0, 1, 1], [], []>} : vector<128x48xf32>, vector<48x160xf32>, vector<128x160xf32> -> vector<128x160xf32>
    %c0_3 = arith.constant 0 : index
    %c0_4 = arith.constant 0 : index
    %3 = vector.load %arg4[%c0_3, %c0_4] : memref<1x160xf32, #tpu.memory_space<vmem>>, vector<1x160xf32>
    %4 = vector.broadcast %3 : vector<1x160xf32> to vector<128x160xf32>
    %5 = arith.addf %2, %4 : vector<128x160xf32>
    %6 = vector.extract_strided_slice %5 {offsets = [0, 0], sizes = [128, 128], strides = [1, 1]} : vector<128x160xf32> to vector<128x128xf32>
    %c0_5 = arith.constant 0 : index
    %c0_6 = arith.constant 0 : index
    %7 = vector.load %arg10[%c0_5, %c0_6] : memref<128x128xf32, #tpu.memory_space<vmem>>, vector<128x128xf32>
    tpu.vector_store %arg10[%c0_5, %c0_6], %6 {strides = array<i32>} : memref<128x128xf32, #tpu.memory_space<vmem>>, vector<128x128xf32>,
    %8 = vector.extract_strided_slice %5 {offsets = [0, 128], sizes = [128, 32], strides = [1, 1]} : vector<128x160xf32> to vector<128x32xf32>
    %9 = math.tanh %8 : vector<128x32xf32>
    %c0_7 = arith.constant 0 : index
    %c0_8 = arith.constant 0 : index
    %10 = vector.load %arg11[%c0_7, %c0_8] : memref<128x32xf32, #tpu.memory_space<vmem>>, vector<128x32xf32>
    tpu.vector_store %arg11[%c0_7, %c0_8], %9 {strides = array<i32>} : memref<128x32xf32, #tpu.memory_space<vmem>>, vector<128x32xf32>,
    %c0_9 = arith.constant 0 : index
    %c0_10 = arith.constant 0 : index
    %11 = vector.load %arg3[%c0_9, %c0_10] : memref<32x128xf32, #tpu.memory_space<vmem>>, vector<32x128xf32>
    %c0_11 = arith.constant 0 : index
    %c0_12 = arith.constant 0 : index
    %12 = vector.load %arg5[%c0_11, %c0_12] : memref<1x128xf32, #tpu.memory_space<vmem>>, vector<1x128xf32>
    %13 = vector.shape_cast %12 : vector<1x128xf32> to vector<1x128xf32>
    %14 = vector.broadcast %13 : vector<1x128xf32> to vector<8x128xf32>
    %c0_13 = arith.constant 0 : index
    %c0_14 = arith.constant 0 : index
    %15 = vector.load %arg6[%c0_13, %c0_14] : memref<1x128xf32, #tpu.memory_space<vmem>>, vector<1x128xf32>
    %16 = vector.shape_cast %15 : vector<1x128xf32> to vector<1x128xf32>
    %17 = vector.broadcast %16 : vector<1x128xf32> to vector<8x128xf32>
    %c0_15 = arith.constant 0 : index
    %c0_16 = arith.constant 0 : index
    %18 = vector.load %arg7[%c0_15, %c0_16] : memref<8x32xf32, #tpu.memory_space<vmem>>, vector<8x32xf32>
    %c0_17 = arith.constant 0 : index
    %c0_18 = arith.constant 0 : index
    %19 = vector.load %arg8[%c0_17, %c0_18] : memref<8x32xf32, #tpu.memory_space<vmem>>, vector<8x32xf32>
    %c0_i32 = arith.constant 0 : i32
    %c8_i32 = arith.constant 8 : i32
    %20 = arith.muli %c0_i32, %c8_i32 : i32
    %21 = tpu.assume_multiple %20, 8 : i32
    %22 = arith.index_cast %21 : i32 to index
    %c0_19 = arith.constant 0 : index
    %23 = vector.load %arg10[%22, %c0_19] : memref<128x128xf32, #tpu.memory_space<vmem>>, vector<8x128xf32>
    %24 = arith.index_cast %21 : i32 to index
    %c0_20 = arith.constant 0 : index
    %25 = vector.load %arg11[%24, %c0_20] : memref<128x32xf32, #tpu.memory_space<vmem>>, vector<8x32xf32>
    %cst_21 = arith.constant dense<0.000000e+00> : vector<8x128xf32>
    %26 = tpu.matmul %18, %11, %cst_21 {dimension_numbers = #tpu.dot_dimension_numbers<[1], [0], [0], [1], [0, 0, 1, 1], [], []>} : vector<8x32xf32>, vector<32x128xf32>, vector<8x128xf32> -> vector<8x128xf32>
    %27 = arith.addf %23, %26 : vector<8x128xf32>
    %28 = math.tanh %27 : vector<8x128xf32>
    %29 = arith.mulf %28, %14 : vector<8x128xf32>
    %30 = arith.addf %29, %17 : vector<8x128xf32>
    %31 = vector.extract_strided_slice %30 {offsets = [0, 0], sizes = [8, 32], strides = [1, 1]} : vector<8x128xf32> to vector<8x32xf32>
    %32 = vector.extract_strided_slice %30 {offsets = [0, 32], sizes = [8, 32], strides = [1, 1]} : vector<8x128xf32> to vector<8x32xf32>
    %33 = vector.extract_strided_slice %30 {offsets = [0, 64], sizes = [8, 32], strides = [1, 1]} : vector<8x128xf32> to vector<8x32xf32>
    %34 = vector.extract_strided_slice %30 {offsets = [0, 96], sizes = [8, 32], strides = [1, 1]} : vector<8x128xf32> to vector<8x32xf32>
    %35 = arith.mulf %32, %19 : vector<8x32xf32>
    %36 = arith.mulf %31, %33 : vector<8x32xf32>
    %37 = arith.addf %35, %36 : vector<8x32xf32>
    %38 = arith.addf %37, %25 : vector<8x32xf32>
    %39 = math.tanh %38 : vector<8x32xf32>
    %40 = arith.mulf %34, %39 : vector<8x32xf32>
    %41 = tpu.concatenate %40, %38 in 1 : vector<8x32xf32>, vector<8x32xf32> -> vector<8x64xf32>
    %42 = arith.index_cast %21 : i32 to index
    %c0_22 = arith.constant 0 : index
    %43 = vector.load %arg9[%42, %c0_22] : memref<128x64xf32, #tpu.memory_space<vmem>>, vector<8x64xf32>
    tpu.vector_store %arg9[%42, %c0_22], %41 {strides = array<i32>} : memref<128x64xf32, #tpu.memory_space<vmem>>, vector<8x64xf32>,
    %c1_i32 = arith.constant 1 : i32
    %c8_i32_23 = arith.constant 8 : i32
    %44 = arith.muli %c1_i32, %c8_i32_23 : i32
    %45 = tpu.assume_multiple %44, 8 : i32
    %46 = arith.index_cast %45 : i32 to index
    %c0_24 = arith.constant 0 : index
    %47 = vector.load %arg10[%46, %c0_24] : memref<128x128xf32, #tpu.memory_space<vmem>>, vector<8x128xf32>
    %48 = arith.index_cast %45 : i32 to index
    %c0_25 = arith.constant 0 : index
    %49 = vector.load %arg11[%48, %c0_25] : memref<128x32xf32, #tpu.memory_space<vmem>>, vector<8x32xf32>
    %cst_26 = arith.constant dense<0.000000e+00> : vector<8x128xf32>
    %50 = tpu.matmul %40, %11, %cst_26 {dimension_numbers = #tpu.dot_dimension_numbers<[1], [0], [0], [1], [0, 0, 1, 1], [], []>} : vector<8x32xf32>, vector<32x128xf32>, vector<8x128xf32> -> vector<8x128xf32>
    %51 = arith.addf %47, %50 : vector<8x128xf32>
    %52 = math.tanh %51 : vector<8x128xf32>
    %53 = arith.mulf %52, %14 : vector<8x128xf32>
    %54 = arith.addf %53, %17 : vector<8x128xf32>
    %55 = vector.extract_strided_slice %54 {offsets = [0, 0], sizes = [8, 32], strides = [1, 1]} : vector<8x128xf32> to vector<8x32xf32>
    %56 = vector.extract_strided_slice %54 {offsets = [0, 32], sizes = [8, 32], strides = [1, 1]} : vector<8x128xf32> to vector<8x32xf32>
    %57 = vector.extract_strided_slice %54 {offsets = [0, 64], sizes = [8, 32], strides = [1, 1]} : vector<8x128xf32> to vector<8x32xf32>
    %58 = vector.extract_strided_slice %54 {offsets = [0, 96], sizes = [8, 32], strides = [1, 1]} : vector<8x128xf32> to vector<8x32xf32>
    %59 = arith.mulf %56, %38 : vector<8x32xf32>
    %60 = arith.mulf %55, %57 : vector<8x32xf32>
    %61 = arith.addf %59, %60 : vector<8x32xf32>
    %62 = arith.addf %61, %49 : vector<8x32xf32>
    %63 = math.tanh %62 : vector<8x32xf32>
    %64 = arith.mulf %58, %63 : vector<8x32xf32>
    %65 = tpu.concatenate %64, %62 in 1 : vector<8x32xf32>, vector<8x32xf32> -> vector<8x64xf32>
    %66 = arith.index_cast %45 : i32 to index
    %c0_27 = arith.constant 0 : index
    %67 = vector.load %arg9[%66, %c0_27] : memref<128x64xf32, #tpu.memory_space<vmem>>, vector<8x64xf32>
    tpu.vector_store %arg9[%66, %c0_27], %65 {strides = array<i32>} : memref<128x64xf32, #tpu.memory_space<vmem>>, vector<8x64xf32>,
    %c2_i32 = arith.constant 2 : i32
    %c8_i32_28 = arith.constant 8 : i32
    %68 = arith.muli %c2_i32, %c8_i32_28 : i32
    %69 = tpu.assume_multiple %68, 8 : i32
    %70 = arith.index_cast %69 : i32 to index
    %c0_29 = arith.constant 0 : index
    %71 = vector.load %arg10[%70, %c0_29] : memref<128x128xf32, #tpu.memory_space<vmem>>, vector<8x128xf32>
    %72 = arith.index_cast %69 : i32 to index
    %c0_30 = arith.constant 0 : index
    %73 = vector.load %arg11[%72, %c0_30] : memref<128x32xf32, #tpu.memory_space<vmem>>, vector<8x32xf32>
    %cst_31 = arith.constant dense<0.000000e+00> : vector<8x128xf32>
    %74 = tpu.matmul %64, %11, %cst_31 {dimension_numbers = #tpu.dot_dimension_numbers<[1], [0], [0], [1], [0, 0, 1, 1], [], []>} : vector<8x32xf32>, vector<32x128xf32>, vector<8x128xf32> -> vector<8x128xf32>
    %75 = arith.addf %71, %74 : vector<8x128xf32>
    %76 = math.tanh %75 : vector<8x128xf32>
    %77 = arith.mulf %76, %14 : vector<8x128xf32>
    %78 = arith.addf %77, %17 : vector<8x128xf32>
    %79 = vector.extract_strided_slice %78 {offsets = [0, 0], sizes = [8, 32], strides = [1, 1]} : vector<8x128xf32> to vector<8x32xf32>
    %80 = vector.extract_strided_slice %78 {offsets = [0, 32], sizes = [8, 32], strides = [1, 1]} : vector<8x128xf32> to vector<8x32xf32>
    %81 = vector.extract_strided_slice %78 {offsets = [0, 64], sizes = [8, 32], strides = [1, 1]} : vector<8x128xf32> to vector<8x32xf32>
    %82 = vector.extract_strided_slice %78 {offsets = [0, 96], sizes = [8, 32], strides = [1, 1]} : vector<8x128xf32> to vector<8x32xf32>
    %83 = arith.mulf %80, %62 : vector<8x32xf32>
    %84 = arith.mulf %79, %81 : vector<8x32xf32>
    %85 = arith.addf %83, %84 : vector<8x32xf32>
    %86 = arith.addf %85, %73 : vector<8x32xf32>
    %87 = math.tanh %86 : vector<8x32xf32>
    %88 = arith.mulf %82, %87 : vector<8x32xf32>
    %89 = tpu.concatenate %88, %86 in 1 : vector<8x32xf32>, vector<8x32xf32> -> vector<8x64xf32>
    %90 = arith.index_cast %69 : i32 to index
    %c0_32 = arith.constant 0 : index
    %91 = vector.load %arg9[%90, %c0_32] : memref<128x64xf32, #tpu.memory_space<vmem>>, vector<8x64xf32>
    tpu.vector_store %arg9[%90, %c0_32], %89 {strides = array<i32>} : memref<128x64xf32, #tpu.memory_space<vmem>>, vector<8x64xf32>,
    %c3_i32 = arith.constant 3 : i32
    %c8_i32_33 = arith.constant 8 : i32
    %92 = arith.muli %c3_i32, %c8_i32_33 : i32
    %93 = tpu.assume_multiple %92, 8 : i32
    %94 = arith.index_cast %93 : i32 to index
    %c0_34 = arith.constant 0 : index
    %95 = vector.load %arg10[%94, %c0_34] : memref<128x128xf32, #tpu.memory_space<vmem>>, vector<8x128xf32>
    %96 = arith.index_cast %93 : i32 to index
    %c0_35 = arith.constant 0 : index
    %97 = vector.load %arg11[%96, %c0_35] : memref<128x32xf32, #tpu.memory_space<vmem>>, vector<8x32xf32>
    %cst_36 = arith.constant dense<0.000000e+00> : vector<8x128xf32>
    %98 = tpu.matmul %88, %11, %cst_36 {dimension_numbers = #tpu.dot_dimension_numbers<[1], [0], [0], [1], [0, 0, 1, 1], [], []>} : vector<8x32xf32>, vector<32x128xf32>, vector<8x128xf32> -> vector<8x128xf32>
    %99 = arith.addf %95, %98 : vector<8x128xf32>
    %100 = math.tanh %99 : vector<8x128xf32>
    %101 = arith.mulf %100, %14 : vector<8x128xf32>
    %102 = arith.addf %101, %17 : vector<8x128xf32>
    %103 = vector.extract_strided_slice %102 {offsets = [0, 0], sizes = [8, 32], strides = [1, 1]} : vector<8x128xf32> to vector<8x32xf32>
    %104 = vector.extract_strided_slice %102 {offsets = [0, 32], sizes = [8, 32], strides = [1, 1]} : vector<8x128xf32> to vector<8x32xf32>
    %105 = vector.extract_strided_slice %102 {offsets = [0, 64], sizes = [8, 32], strides = [1, 1]} : vector<8x128xf32> to vector<8x32xf32>
    %106 = vector.extract_strided_slice %102 {offsets = [0, 96], sizes = [8, 32], strides = [1, 1]} : vector<8x128xf32> to vector<8x32xf32>
    %107 = arith.mulf %104, %86 : vector<8x32xf32>
    %108 = arith.mulf %103, %105 : vector<8x32xf32>
    %109 = arith.addf %107, %108 : vector<8x32xf32>
    %110 = arith.addf %109, %97 : vector<8x32xf32>
    %111 = math.tanh %110 : vector<8x32xf32>
    %112 = arith.mulf %106, %111 : vector<8x32xf32>
    %113 = tpu.concatenate %112, %110 in 1 : vector<8x32xf32>, vector<8x32xf32> -> vector<8x64xf32>
    %114 = arith.index_cast %93 : i32 to index
    %c0_37 = arith.constant 0 : index
    %115 = vector.load %arg9[%114, %c0_37] : memref<128x64xf32, #tpu.memory_space<vmem>>, vector<8x64xf32>
    tpu.vector_store %arg9[%114, %c0_37], %113 {strides = array<i32>} : memref<128x64xf32, #tpu.memory_space<vmem>>, vector<8x64xf32>,
    %c4_i32 = arith.constant 4 : i32
    %c8_i32_38 = arith.constant 8 : i32
    %116 = arith.muli %c4_i32, %c8_i32_38 : i32
    %117 = tpu.assume_multiple %116, 8 : i32
    %118 = arith.index_cast %117 : i32 to index
    %c0_39 = arith.constant 0 : index
    %119 = vector.load %arg10[%118, %c0_39] : memref<128x128xf32, #tpu.memory_space<vmem>>, vector<8x128xf32>
    %120 = arith.index_cast %117 : i32 to index
    %c0_40 = arith.constant 0 : index
    %121 = vector.load %arg11[%120, %c0_40] : memref<128x32xf32, #tpu.memory_space<vmem>>, vector<8x32xf32>
    %cst_41 = arith.constant dense<0.000000e+00> : vector<8x128xf32>
    %122 = tpu.matmul %112, %11, %cst_41 {dimension_numbers = #tpu.dot_dimension_numbers<[1], [0], [0], [1], [0, 0, 1, 1], [], []>} : vector<8x32xf32>, vector<32x128xf32>, vector<8x128xf32> -> vector<8x128xf32>
    %123 = arith.addf %119, %122 : vector<8x128xf32>
    %124 = math.tanh %123 : vector<8x128xf32>
    %125 = arith.mulf %124, %14 : vector<8x128xf32>
    %126 = arith.addf %125, %17 : vector<8x128xf32>
    %127 = vector.extract_strided_slice %126 {offsets = [0, 0], sizes = [8, 32], strides = [1, 1]} : vector<8x128xf32> to vector<8x32xf32>
    %128 = vector.extract_strided_slice %126 {offsets = [0, 32], sizes = [8, 32], strides = [1, 1]} : vector<8x128xf32> to vector<8x32xf32>
    %129 = vector.extract_strided_slice %126 {offsets = [0, 64], sizes = [8, 32], strides = [1, 1]} : vector<8x128xf32> to vector<8x32xf32>
    %130 = vector.extract_strided_slice %126 {offsets = [0, 96], sizes = [8, 32], strides = [1, 1]} : vector<8x128xf32> to vector<8x32xf32>
    %131 = arith.mulf %128, %110 : vector<8x32xf32>
    %132 = arith.mulf %127, %129 : vector<8x32xf32>
    %133 = arith.addf %131, %132 : vector<8x32xf32>
    %134 = arith.addf %133, %121 : vector<8x32xf32>
    %135 = math.tanh %134 : vector<8x32xf32>
    %136 = arith.mulf %130, %135 : vector<8x32xf32>
    %137 = tpu.concatenate %136, %134 in 1 : vector<8x32xf32>, vector<8x32xf32> -> vector<8x64xf32>
    %138 = arith.index_cast %117 : i32 to index
    %c0_42 = arith.constant 0 : index
    %139 = vector.load %arg9[%138, %c0_42] : memref<128x64xf32, #tpu.memory_space<vmem>>, vector<8x64xf32>
    tpu.vector_store %arg9[%138, %c0_42], %137 {strides = array<i32>} : memref<128x64xf32, #tpu.memory_space<vmem>>, vector<8x64xf32>,
    %c5_i32 = arith.constant 5 : i32
    %c8_i32_43 = arith.constant 8 : i32
    %140 = arith.muli %c5_i32, %c8_i32_43 : i32
    %141 = tpu.assume_multiple %140, 8 : i32
    %142 = arith.index_cast %141 : i32 to index
    %c0_44 = arith.constant 0 : index
    %143 = vector.load %arg10[%142, %c0_44] : memref<128x128xf32, #tpu.memory_space<vmem>>, vector<8x128xf32>
    %144 = arith.index_cast %141 : i32 to index
    %c0_45 = arith.constant 0 : index
    %145 = vector.load %arg11[%144, %c0_45] : memref<128x32xf32, #tpu.memory_space<vmem>>, vector<8x32xf32>
    %cst_46 = arith.constant dense<0.000000e+00> : vector<8x128xf32>
    %146 = tpu.matmul %136, %11, %cst_46 {dimension_numbers = #tpu.dot_dimension_numbers<[1], [0], [0], [1], [0, 0, 1, 1], [], []>} : vector<8x32xf32>, vector<32x128xf32>, vector<8x128xf32> -> vector<8x128xf32>
    %147 = arith.addf %143, %146 : vector<8x128xf32>
    %148 = math.tanh %147 : vector<8x128xf32>
    %149 = arith.mulf %148, %14 : vector<8x128xf32>
    %150 = arith.addf %149, %17 : vector<8x128xf32>
    %151 = vector.extract_strided_slice %150 {offsets = [0, 0], sizes = [8, 32], strides = [1, 1]} : vector<8x128xf32> to vector<8x32xf32>
    %152 = vector.extract_strided_slice %150 {offsets = [0, 32], sizes = [8, 32], strides = [1, 1]} : vector<8x128xf32> to vector<8x32xf32>
    %153 = vector.extract_strided_slice %150 {offsets = [0, 64], sizes = [8, 32], strides = [1, 1]} : vector<8x128xf32> to vector<8x32xf32>
    %154 = vector.extract_strided_slice %150 {offsets = [0, 96], sizes = [8, 32], strides = [1, 1]} : vector<8x128xf32> to vector<8x32xf32>
    %155 = arith.mulf %152, %134 : vector<8x32xf32>
    %156 = arith.mulf %151, %153 : vector<8x32xf32>
    %157 = arith.addf %155, %156 : vector<8x32xf32>
    %158 = arith.addf %157, %145 : vector<8x32xf32>
    %159 = math.tanh %158 : vector<8x32xf32>
    %160 = arith.mulf %154, %159 : vector<8x32xf32>
    %161 = tpu.concatenate %160, %158 in 1 : vector<8x32xf32>, vector<8x32xf32> -> vector<8x64xf32>
    %162 = arith.index_cast %141 : i32 to index
    %c0_47 = arith.constant 0 : index
    %163 = vector.load %arg9[%162, %c0_47] : memref<128x64xf32, #tpu.memory_space<vmem>>, vector<8x64xf32>
    tpu.vector_store %arg9[%162, %c0_47], %161 {strides = array<i32>} : memref<128x64xf32, #tpu.memory_space<vmem>>, vector<8x64xf32>,
    %c6_i32 = arith.constant 6 : i32
    %c8_i32_48 = arith.constant 8 : i32
    %164 = arith.muli %c6_i32, %c8_i32_48 : i32
    %165 = tpu.assume_multiple %164, 8 : i32
    %166 = arith.index_cast %165 : i32 to index
    %c0_49 = arith.constant 0 : index
    %167 = vector.load %arg10[%166, %c0_49] : memref<128x128xf32, #tpu.memory_space<vmem>>, vector<8x128xf32>
    %168 = arith.index_cast %165 : i32 to index
    %c0_50 = arith.constant 0 : index
    %169 = vector.load %arg11[%168, %c0_50] : memref<128x32xf32, #tpu.memory_space<vmem>>, vector<8x32xf32>
    %cst_51 = arith.constant dense<0.000000e+00> : vector<8x128xf32>
    %170 = tpu.matmul %160, %11, %cst_51 {dimension_numbers = #tpu.dot_dimension_numbers<[1], [0], [0], [1], [0, 0, 1, 1], [], []>} : vector<8x32xf32>, vector<32x128xf32>, vector<8x128xf32> -> vector<8x128xf32>
    %171 = arith.addf %167, %170 : vector<8x128xf32>
    %172 = math.tanh %171 : vector<8x128xf32>
    %173 = arith.mulf %172, %14 : vector<8x128xf32>
    %174 = arith.addf %173, %17 : vector<8x128xf32>
    %175 = vector.extract_strided_slice %174 {offsets = [0, 0], sizes = [8, 32], strides = [1, 1]} : vector<8x128xf32> to vector<8x32xf32>
    %176 = vector.extract_strided_slice %174 {offsets = [0, 32], sizes = [8, 32], strides = [1, 1]} : vector<8x128xf32> to vector<8x32xf32>
    %177 = vector.extract_strided_slice %174 {offsets = [0, 64], sizes = [8, 32], strides = [1, 1]} : vector<8x128xf32> to vector<8x32xf32>
    %178 = vector.extract_strided_slice %174 {offsets = [0, 96], sizes = [8, 32], strides = [1, 1]} : vector<8x128xf32> to vector<8x32xf32>
    %179 = arith.mulf %176, %158 : vector<8x32xf32>
    %180 = arith.mulf %175, %177 : vector<8x32xf32>
    %181 = arith.addf %179, %180 : vector<8x32xf32>
    %182 = arith.addf %181, %169 : vector<8x32xf32>
    %183 = math.tanh %182 : vector<8x32xf32>
    %184 = arith.mulf %178, %183 : vector<8x32xf32>
    %185 = tpu.concatenate %184, %182 in 1 : vector<8x32xf32>, vector<8x32xf32> -> vector<8x64xf32>
    %186 = arith.index_cast %165 : i32 to index
    %c0_52 = arith.constant 0 : index
    %187 = vector.load %arg9[%186, %c0_52] : memref<128x64xf32, #tpu.memory_space<vmem>>, vector<8x64xf32>
    tpu.vector_store %arg9[%186, %c0_52], %185 {strides = array<i32>} : memref<128x64xf32, #tpu.memory_space<vmem>>, vector<8x64xf32>,
    %c7_i32 = arith.constant 7 : i32
    %c8_i32_53 = arith.constant 8 : i32
    %188 = arith.muli %c7_i32, %c8_i32_53 : i32
    %189 = tpu.assume_multiple %188, 8 : i32
    %190 = arith.index_cast %189 : i32 to index
    %c0_54 = arith.constant 0 : index
    %191 = vector.load %arg10[%190, %c0_54] : memref<128x128xf32, #tpu.memory_space<vmem>>, vector<8x128xf32>
    %192 = arith.index_cast %189 : i32 to index
    %c0_55 = arith.constant 0 : index
    %193 = vector.load %arg11[%192, %c0_55] : memref<128x32xf32, #tpu.memory_space<vmem>>, vector<8x32xf32>
    %cst_56 = arith.constant dense<0.000000e+00> : vector<8x128xf32>
    %194 = tpu.matmul %184, %11, %cst_56 {dimension_numbers = #tpu.dot_dimension_numbers<[1], [0], [0], [1], [0, 0, 1, 1], [], []>} : vector<8x32xf32>, vector<32x128xf32>, vector<8x128xf32> -> vector<8x128xf32>
    %195 = arith.addf %191, %194 : vector<8x128xf32>
    %196 = math.tanh %195 : vector<8x128xf32>
    %197 = arith.mulf %196, %14 : vector<8x128xf32>
    %198 = arith.addf %197, %17 : vector<8x128xf32>
    %199 = vector.extract_strided_slice %198 {offsets = [0, 0], sizes = [8, 32], strides = [1, 1]} : vector<8x128xf32> to vector<8x32xf32>
    %200 = vector.extract_strided_slice %198 {offsets = [0, 32], sizes = [8, 32], strides = [1, 1]} : vector<8x128xf32> to vector<8x32xf32>
    %201 = vector.extract_strided_slice %198 {offsets = [0, 64], sizes = [8, 32], strides = [1, 1]} : vector<8x128xf32> to vector<8x32xf32>
    %202 = vector.extract_strided_slice %198 {offsets = [0, 96], sizes = [8, 32], strides = [1, 1]} : vector<8x128xf32> to vector<8x32xf32>
    %203 = arith.mulf %200, %182 : vector<8x32xf32>
    %204 = arith.mulf %199, %201 : vector<8x32xf32>
    %205 = arith.addf %203, %204 : vector<8x32xf32>
    %206 = arith.addf %205, %193 : vector<8x32xf32>
    %207 = math.tanh %206 : vector<8x32xf32>
    %208 = arith.mulf %202, %207 : vector<8x32xf32>
    %209 = tpu.concatenate %208, %206 in 1 : vector<8x32xf32>, vector<8x32xf32> -> vector<8x64xf32>
    %210 = arith.index_cast %189 : i32 to index
    %c0_57 = arith.constant 0 : index
    %211 = vector.load %arg9[%210, %c0_57] : memref<128x64xf32, #tpu.memory_space<vmem>>, vector<8x64xf32>
    tpu.vector_store %arg9[%210, %c0_57], %209 {strides = array<i32>} : memref<128x64xf32, #tpu.memory_space<vmem>>, vector<8x64xf32>,
    %c8_i32_58 = arith.constant 8 : i32
    %c8_i32_59 = arith.constant 8 : i32
    %212 = arith.muli %c8_i32_58, %c8_i32_59 : i32
    %213 = tpu.assume_multiple %212, 8 : i32
    %214 = arith.index_cast %213 : i32 to index
    %c0_60 = arith.constant 0 : index
    %215 = vector.load %arg10[%214, %c0_60] : memref<128x128xf32, #tpu.memory_space<vmem>>, vector<8x128xf32>
    %216 = arith.index_cast %213 : i32 to index
    %c0_61 = arith.constant 0 : index
    %217 = vector.load %arg11[%216, %c0_61] : memref<128x32xf32, #tpu.memory_space<vmem>>, vector<8x32xf32>
    %cst_62 = arith.constant dense<0.000000e+00> : vector<8x128xf32>
    %218 = tpu.matmul %208, %11, %cst_62 {dimension_numbers = #tpu.dot_dimension_numbers<[1], [0], [0], [1], [0, 0, 1, 1], [], []>} : vector<8x32xf32>, vector<32x128xf32>, vector<8x128xf32> -> vector<8x128xf32>
    %219 = arith.addf %215, %218 : vector<8x128xf32>
    %220 = math.tanh %219 : vector<8x128xf32>
    %221 = arith.mulf %220, %14 : vector<8x128xf32>
    %222 = arith.addf %221, %17 : vector<8x128xf32>
    %223 = vector.extract_strided_slice %222 {offsets = [0, 0], sizes = [8, 32], strides = [1, 1]} : vector<8x128xf32> to vector<8x32xf32>
    %224 = vector.extract_strided_slice %222 {offsets = [0, 32], sizes = [8, 32], strides = [1, 1]} : vector<8x128xf32> to vector<8x32xf32>
    %225 = vector.extract_strided_slice %222 {offsets = [0, 64], sizes = [8, 32], strides = [1, 1]} : vector<8x128xf32> to vector<8x32xf32>
    %226 = vector.extract_strided_slice %222 {offsets = [0, 96], sizes = [8, 32], strides = [1, 1]} : vector<8x128xf32> to vector<8x32xf32>
    %227 = arith.mulf %224, %206 : vector<8x32xf32>
    %228 = arith.mulf %223, %225 : vector<8x32xf32>
    %229 = arith.addf %227, %228 : vector<8x32xf32>
    %230 = arith.addf %229, %217 : vector<8x32xf32>
    %231 = math.tanh %230 : vector<8x32xf32>
    %232 = arith.mulf %226, %231 : vector<8x32xf32>
    %233 = tpu.concatenate %232, %230 in 1 : vector<8x32xf32>, vector<8x32xf32> -> vector<8x64xf32>
    %234 = arith.index_cast %213 : i32 to index
    %c0_63 = arith.constant 0 : index
    %235 = vector.load %arg9[%234, %c0_63] : memref<128x64xf32, #tpu.memory_space<vmem>>, vector<8x64xf32>
    tpu.vector_store %arg9[%234, %c0_63], %233 {strides = array<i32>} : memref<128x64xf32, #tpu.memory_space<vmem>>, vector<8x64xf32>,
    %c9_i32 = arith.constant 9 : i32
    %c8_i32_64 = arith.constant 8 : i32
    %236 = arith.muli %c9_i32, %c8_i32_64 : i32
    %237 = tpu.assume_multiple %236, 8 : i32
    %238 = arith.index_cast %237 : i32 to index
    %c0_65 = arith.constant 0 : index
    %239 = vector.load %arg10[%238, %c0_65] : memref<128x128xf32, #tpu.memory_space<vmem>>, vector<8x128xf32>
    %240 = arith.index_cast %237 : i32 to index
    %c0_66 = arith.constant 0 : index
    %241 = vector.load %arg11[%240, %c0_66] : memref<128x32xf32, #tpu.memory_space<vmem>>, vector<8x32xf32>
    %cst_67 = arith.constant dense<0.000000e+00> : vector<8x128xf32>
    %242 = tpu.matmul %232, %11, %cst_67 {dimension_numbers = #tpu.dot_dimension_numbers<[1], [0], [0], [1], [0, 0, 1, 1], [], []>} : vector<8x32xf32>, vector<32x128xf32>, vector<8x128xf32> -> vector<8x128xf32>
    %243 = arith.addf %239, %242 : vector<8x128xf32>
    %244 = math.tanh %243 : vector<8x128xf32>
    %245 = arith.mulf %244, %14 : vector<8x128xf32>
    %246 = arith.addf %245, %17 : vector<8x128xf32>
    %247 = vector.extract_strided_slice %246 {offsets = [0, 0], sizes = [8, 32], strides = [1, 1]} : vector<8x128xf32> to vector<8x32xf32>
    %248 = vector.extract_strided_slice %246 {offsets = [0, 32], sizes = [8, 32], strides = [1, 1]} : vector<8x128xf32> to vector<8x32xf32>
    %249 = vector.extract_strided_slice %246 {offsets = [0, 64], sizes = [8, 32], strides = [1, 1]} : vector<8x128xf32> to vector<8x32xf32>
    %250 = vector.extract_strided_slice %246 {offsets = [0, 96], sizes = [8, 32], strides = [1, 1]} : vector<8x128xf32> to vector<8x32xf32>
    %251 = arith.mulf %248, %230 : vector<8x32xf32>
    %252 = arith.mulf %247, %249 : vector<8x32xf32>
    %253 = arith.addf %251, %252 : vector<8x32xf32>
    %254 = arith.addf %253, %241 : vector<8x32xf32>
    %255 = math.tanh %254 : vector<8x32xf32>
    %256 = arith.mulf %250, %255 : vector<8x32xf32>
    %257 = tpu.concatenate %256, %254 in 1 : vector<8x32xf32>, vector<8x32xf32> -> vector<8x64xf32>
    %258 = arith.index_cast %237 : i32 to index
    %c0_68 = arith.constant 0 : index
    %259 = vector.load %arg9[%258, %c0_68] : memref<128x64xf32, #tpu.memory_space<vmem>>, vector<8x64xf32>
    tpu.vector_store %arg9[%258, %c0_68], %257 {strides = array<i32>} : memref<128x64xf32, #tpu.memory_space<vmem>>, vector<8x64xf32>,
    %c10_i32 = arith.constant 10 : i32
    %c8_i32_69 = arith.constant 8 : i32
    %260 = arith.muli %c10_i32, %c8_i32_69 : i32
    %261 = tpu.assume_multiple %260, 8 : i32
    %262 = arith.index_cast %261 : i32 to index
    %c0_70 = arith.constant 0 : index
    %263 = vector.load %arg10[%262, %c0_70] : memref<128x128xf32, #tpu.memory_space<vmem>>, vector<8x128xf32>
    %264 = arith.index_cast %261 : i32 to index
    %c0_71 = arith.constant 0 : index
    %265 = vector.load %arg11[%264, %c0_71] : memref<128x32xf32, #tpu.memory_space<vmem>>, vector<8x32xf32>
    %cst_72 = arith.constant dense<0.000000e+00> : vector<8x128xf32>
    %266 = tpu.matmul %256, %11, %cst_72 {dimension_numbers = #tpu.dot_dimension_numbers<[1], [0], [0], [1], [0, 0, 1, 1], [], []>} : vector<8x32xf32>, vector<32x128xf32>, vector<8x128xf32> -> vector<8x128xf32>
    %267 = arith.addf %263, %266 : vector<8x128xf32>
    %268 = math.tanh %267 : vector<8x128xf32>
    %269 = arith.mulf %268, %14 : vector<8x128xf32>
    %270 = arith.addf %269, %17 : vector<8x128xf32>
    %271 = vector.extract_strided_slice %270 {offsets = [0, 0], sizes = [8, 32], strides = [1, 1]} : vector<8x128xf32> to vector<8x32xf32>
    %272 = vector.extract_strided_slice %270 {offsets = [0, 32], sizes = [8, 32], strides = [1, 1]} : vector<8x128xf32> to vector<8x32xf32>
    %273 = vector.extract_strided_slice %270 {offsets = [0, 64], sizes = [8, 32], strides = [1, 1]} : vector<8x128xf32> to vector<8x32xf32>
    %274 = vector.extract_strided_slice %270 {offsets = [0, 96], sizes = [8, 32], strides = [1, 1]} : vector<8x128xf32> to vector<8x32xf32>
    %275 = arith.mulf %272, %254 : vector<8x32xf32>
    %276 = arith.mulf %271, %273 : vector<8x32xf32>
    %277 = arith.addf %275, %276 : vector<8x32xf32>
    %278 = arith.addf %277, %265 : vector<8x32xf32>
    %279 = math.tanh %278 : vector<8x32xf32>
    %280 = arith.mulf %274, %279 : vector<8x32xf32>
    %281 = tpu.concatenate %280, %278 in 1 : vector<8x32xf32>, vector<8x32xf32> -> vector<8x64xf32>
    %282 = arith.index_cast %261 : i32 to index
    %c0_73 = arith.constant 0 : index
    %283 = vector.load %arg9[%282, %c0_73] : memref<128x64xf32, #tpu.memory_space<vmem>>, vector<8x64xf32>
    tpu.vector_store %arg9[%282, %c0_73], %281 {strides = array<i32>} : memref<128x64xf32, #tpu.memory_space<vmem>>, vector<8x64xf32>,
    %c11_i32 = arith.constant 11 : i32
    %c8_i32_74 = arith.constant 8 : i32
    %284 = arith.muli %c11_i32, %c8_i32_74 : i32
    %285 = tpu.assume_multiple %284, 8 : i32
    %286 = arith.index_cast %285 : i32 to index
    %c0_75 = arith.constant 0 : index
    %287 = vector.load %arg10[%286, %c0_75] : memref<128x128xf32, #tpu.memory_space<vmem>>, vector<8x128xf32>
    %288 = arith.index_cast %285 : i32 to index
    %c0_76 = arith.constant 0 : index
    %289 = vector.load %arg11[%288, %c0_76] : memref<128x32xf32, #tpu.memory_space<vmem>>, vector<8x32xf32>
    %cst_77 = arith.constant dense<0.000000e+00> : vector<8x128xf32>
    %290 = tpu.matmul %280, %11, %cst_77 {dimension_numbers = #tpu.dot_dimension_numbers<[1], [0], [0], [1], [0, 0, 1, 1], [], []>} : vector<8x32xf32>, vector<32x128xf32>, vector<8x128xf32> -> vector<8x128xf32>
    %291 = arith.addf %287, %290 : vector<8x128xf32>
    %292 = math.tanh %291 : vector<8x128xf32>
    %293 = arith.mulf %292, %14 : vector<8x128xf32>
    %294 = arith.addf %293, %17 : vector<8x128xf32>
    %295 = vector.extract_strided_slice %294 {offsets = [0, 0], sizes = [8, 32], strides = [1, 1]} : vector<8x128xf32> to vector<8x32xf32>
    %296 = vector.extract_strided_slice %294 {offsets = [0, 32], sizes = [8, 32], strides = [1, 1]} : vector<8x128xf32> to vector<8x32xf32>
    %297 = vector.extract_strided_slice %294 {offsets = [0, 64], sizes = [8, 32], strides = [1, 1]} : vector<8x128xf32> to vector<8x32xf32>
    %298 = vector.extract_strided_slice %294 {offsets = [0, 96], sizes = [8, 32], strides = [1, 1]} : vector<8x128xf32> to vector<8x32xf32>
    %299 = arith.mulf %296, %278 : vector<8x32xf32>
    %300 = arith.mulf %295, %297 : vector<8x32xf32>
    %301 = arith.addf %299, %300 : vector<8x32xf32>
    %302 = arith.addf %301, %289 : vector<8x32xf32>
    %303 = math.tanh %302 : vector<8x32xf32>
    %304 = arith.mulf %298, %303 : vector<8x32xf32>
    %305 = tpu.concatenate %304, %302 in 1 : vector<8x32xf32>, vector<8x32xf32> -> vector<8x64xf32>
    %306 = arith.index_cast %285 : i32 to index
    %c0_78 = arith.constant 0 : index
    %307 = vector.load %arg9[%306, %c0_78] : memref<128x64xf32, #tpu.memory_space<vmem>>, vector<8x64xf32>
    tpu.vector_store %arg9[%306, %c0_78], %305 {strides = array<i32>} : memref<128x64xf32, #tpu.memory_space<vmem>>, vector<8x64xf32>,
    %c12_i32 = arith.constant 12 : i32
    %c8_i32_79 = arith.constant 8 : i32
    %308 = arith.muli %c12_i32, %c8_i32_79 : i32
    %309 = tpu.assume_multiple %308, 8 : i32
    %310 = arith.index_cast %309 : i32 to index
    %c0_80 = arith.constant 0 : index
    %311 = vector.load %arg10[%310, %c0_80] : memref<128x128xf32, #tpu.memory_space<vmem>>, vector<8x128xf32>
    %312 = arith.index_cast %309 : i32 to index
    %c0_81 = arith.constant 0 : index
    %313 = vector.load %arg11[%312, %c0_81] : memref<128x32xf32, #tpu.memory_space<vmem>>, vector<8x32xf32>
    %cst_82 = arith.constant dense<0.000000e+00> : vector<8x128xf32>
    %314 = tpu.matmul %304, %11, %cst_82 {dimension_numbers = #tpu.dot_dimension_numbers<[1], [0], [0], [1], [0, 0, 1, 1], [], []>} : vector<8x32xf32>, vector<32x128xf32>, vector<8x128xf32> -> vector<8x128xf32>
    %315 = arith.addf %311, %314 : vector<8x128xf32>
    %316 = math.tanh %315 : vector<8x128xf32>
    %317 = arith.mulf %316, %14 : vector<8x128xf32>
    %318 = arith.addf %317, %17 : vector<8x128xf32>
    %319 = vector.extract_strided_slice %318 {offsets = [0, 0], sizes = [8, 32], strides = [1, 1]} : vector<8x128xf32> to vector<8x32xf32>
    %320 = vector.extract_strided_slice %318 {offsets = [0, 32], sizes = [8, 32], strides = [1, 1]} : vector<8x128xf32> to vector<8x32xf32>
    %321 = vector.extract_strided_slice %318 {offsets = [0, 64], sizes = [8, 32], strides = [1, 1]} : vector<8x128xf32> to vector<8x32xf32>
    %322 = vector.extract_strided_slice %318 {offsets = [0, 96], sizes = [8, 32], strides = [1, 1]} : vector<8x128xf32> to vector<8x32xf32>
    %323 = arith.mulf %320, %302 : vector<8x32xf32>
    %324 = arith.mulf %319, %321 : vector<8x32xf32>
    %325 = arith.addf %323, %324 : vector<8x32xf32>
    %326 = arith.addf %325, %313 : vector<8x32xf32>
    %327 = math.tanh %326 : vector<8x32xf32>
    %328 = arith.mulf %322, %327 : vector<8x32xf32>
    %329 = tpu.concatenate %328, %326 in 1 : vector<8x32xf32>, vector<8x32xf32> -> vector<8x64xf32>
    %330 = arith.index_cast %309 : i32 to index
    %c0_83 = arith.constant 0 : index
    %331 = vector.load %arg9[%330, %c0_83] : memref<128x64xf32, #tpu.memory_space<vmem>>, vector<8x64xf32>
    tpu.vector_store %arg9[%330, %c0_83], %329 {strides = array<i32>} : memref<128x64xf32, #tpu.memory_space<vmem>>, vector<8x64xf32>,
    %c13_i32 = arith.constant 13 : i32
    %c8_i32_84 = arith.constant 8 : i32
    %332 = arith.muli %c13_i32, %c8_i32_84 : i32
    %333 = tpu.assume_multiple %332, 8 : i32
    %334 = arith.index_cast %333 : i32 to index
    %c0_85 = arith.constant 0 : index
    %335 = vector.load %arg10[%334, %c0_85] : memref<128x128xf32, #tpu.memory_space<vmem>>, vector<8x128xf32>
    %336 = arith.index_cast %333 : i32 to index
    %c0_86 = arith.constant 0 : index
    %337 = vector.load %arg11[%336, %c0_86] : memref<128x32xf32, #tpu.memory_space<vmem>>, vector<8x32xf32>
    %cst_87 = arith.constant dense<0.000000e+00> : vector<8x128xf32>
    %338 = tpu.matmul %328, %11, %cst_87 {dimension_numbers = #tpu.dot_dimension_numbers<[1], [0], [0], [1], [0, 0, 1, 1], [], []>} : vector<8x32xf32>, vector<32x128xf32>, vector<8x128xf32> -> vector<8x128xf32>
    %339 = arith.addf %335, %338 : vector<8x128xf32>
    %340 = math.tanh %339 : vector<8x128xf32>
    %341 = arith.mulf %340, %14 : vector<8x128xf32>
    %342 = arith.addf %341, %17 : vector<8x128xf32>
    %343 = vector.extract_strided_slice %342 {offsets = [0, 0], sizes = [8, 32], strides = [1, 1]} : vector<8x128xf32> to vector<8x32xf32>
    %344 = vector.extract_strided_slice %342 {offsets = [0, 32], sizes = [8, 32], strides = [1, 1]} : vector<8x128xf32> to vector<8x32xf32>
    %345 = vector.extract_strided_slice %342 {offsets = [0, 64], sizes = [8, 32], strides = [1, 1]} : vector<8x128xf32> to vector<8x32xf32>
    %346 = vector.extract_strided_slice %342 {offsets = [0, 96], sizes = [8, 32], strides = [1, 1]} : vector<8x128xf32> to vector<8x32xf32>
    %347 = arith.mulf %344, %326 : vector<8x32xf32>
    %348 = arith.mulf %343, %345 : vector<8x32xf32>
    %349 = arith.addf %347, %348 : vector<8x32xf32>
    %350 = arith.addf %349, %337 : vector<8x32xf32>
    %351 = math.tanh %350 : vector<8x32xf32>
    %352 = arith.mulf %346, %351 : vector<8x32xf32>
    %353 = tpu.concatenate %352, %350 in 1 : vector<8x32xf32>, vector<8x32xf32> -> vector<8x64xf32>
    %354 = arith.index_cast %333 : i32 to index
    %c0_88 = arith.constant 0 : index
    %355 = vector.load %arg9[%354, %c0_88] : memref<128x64xf32, #tpu.memory_space<vmem>>, vector<8x64xf32>
    tpu.vector_store %arg9[%354, %c0_88], %353 {strides = array<i32>} : memref<128x64xf32, #tpu.memory_space<vmem>>, vector<8x64xf32>,
    %c14_i32 = arith.constant 14 : i32
    %c8_i32_89 = arith.constant 8 : i32
    %356 = arith.muli %c14_i32, %c8_i32_89 : i32
    %357 = tpu.assume_multiple %356, 8 : i32
    %358 = arith.index_cast %357 : i32 to index
    %c0_90 = arith.constant 0 : index
    %359 = vector.load %arg10[%358, %c0_90] : memref<128x128xf32, #tpu.memory_space<vmem>>, vector<8x128xf32>
    %360 = arith.index_cast %357 : i32 to index
    %c0_91 = arith.constant 0 : index
    %361 = vector.load %arg11[%360, %c0_91] : memref<128x32xf32, #tpu.memory_space<vmem>>, vector<8x32xf32>
    %cst_92 = arith.constant dense<0.000000e+00> : vector<8x128xf32>
    %362 = tpu.matmul %352, %11, %cst_92 {dimension_numbers = #tpu.dot_dimension_numbers<[1], [0], [0], [1], [0, 0, 1, 1], [], []>} : vector<8x32xf32>, vector<32x128xf32>, vector<8x128xf32> -> vector<8x128xf32>
    %363 = arith.addf %359, %362 : vector<8x128xf32>
    %364 = math.tanh %363 : vector<8x128xf32>
    %365 = arith.mulf %364, %14 : vector<8x128xf32>
    %366 = arith.addf %365, %17 : vector<8x128xf32>
    %367 = vector.extract_strided_slice %366 {offsets = [0, 0], sizes = [8, 32], strides = [1, 1]} : vector<8x128xf32> to vector<8x32xf32>
    %368 = vector.extract_strided_slice %366 {offsets = [0, 32], sizes = [8, 32], strides = [1, 1]} : vector<8x128xf32> to vector<8x32xf32>
    %369 = vector.extract_strided_slice %366 {offsets = [0, 64], sizes = [8, 32], strides = [1, 1]} : vector<8x128xf32> to vector<8x32xf32>
    %370 = vector.extract_strided_slice %366 {offsets = [0, 96], sizes = [8, 32], strides = [1, 1]} : vector<8x128xf32> to vector<8x32xf32>
    %371 = arith.mulf %368, %350 : vector<8x32xf32>
    %372 = arith.mulf %367, %369 : vector<8x32xf32>
    %373 = arith.addf %371, %372 : vector<8x32xf32>
    %374 = arith.addf %373, %361 : vector<8x32xf32>
    %375 = math.tanh %374 : vector<8x32xf32>
    %376 = arith.mulf %370, %375 : vector<8x32xf32>
    %377 = tpu.concatenate %376, %374 in 1 : vector<8x32xf32>, vector<8x32xf32> -> vector<8x64xf32>
    %378 = arith.index_cast %357 : i32 to index
    %c0_93 = arith.constant 0 : index
    %379 = vector.load %arg9[%378, %c0_93] : memref<128x64xf32, #tpu.memory_space<vmem>>, vector<8x64xf32>
    tpu.vector_store %arg9[%378, %c0_93], %377 {strides = array<i32>} : memref<128x64xf32, #tpu.memory_space<vmem>>, vector<8x64xf32>,
    %c15_i32 = arith.constant 15 : i32
    %c8_i32_94 = arith.constant 8 : i32
    %380 = arith.muli %c15_i32, %c8_i32_94 : i32
    %381 = tpu.assume_multiple %380, 8 : i32
    %382 = arith.index_cast %381 : i32 to index
    %c0_95 = arith.constant 0 : index
    %383 = vector.load %arg10[%382, %c0_95] : memref<128x128xf32, #tpu.memory_space<vmem>>, vector<8x128xf32>
    %384 = arith.index_cast %381 : i32 to index
    %c0_96 = arith.constant 0 : index
    %385 = vector.load %arg11[%384, %c0_96] : memref<128x32xf32, #tpu.memory_space<vmem>>, vector<8x32xf32>
    %cst_97 = arith.constant dense<0.000000e+00> : vector<8x128xf32>
    %386 = tpu.matmul %376, %11, %cst_97 {dimension_numbers = #tpu.dot_dimension_numbers<[1], [0], [0], [1], [0, 0, 1, 1], [], []>} : vector<8x32xf32>, vector<32x128xf32>, vector<8x128xf32> -> vector<8x128xf32>
    %387 = arith.addf %383, %386 : vector<8x128xf32>
    %388 = math.tanh %387 : vector<8x128xf32>
    %389 = arith.mulf %388, %14 : vector<8x128xf32>
    %390 = arith.addf %389, %17 : vector<8x128xf32>
    %391 = vector.extract_strided_slice %390 {offsets = [0, 0], sizes = [8, 32], strides = [1, 1]} : vector<8x128xf32> to vector<8x32xf32>
    %392 = vector.extract_strided_slice %390 {offsets = [0, 32], sizes = [8, 32], strides = [1, 1]} : vector<8x128xf32> to vector<8x32xf32>
    %393 = vector.extract_strided_slice %390 {offsets = [0, 64], sizes = [8, 32], strides = [1, 1]} : vector<8x128xf32> to vector<8x32xf32>
    %394 = vector.extract_strided_slice %390 {offsets = [0, 96], sizes = [8, 32], strides = [1, 1]} : vector<8x128xf32> to vector<8x32xf32>
    %395 = arith.mulf %392, %374 : vector<8x32xf32>
    %396 = arith.mulf %391, %393 : vector<8x32xf32>
    %397 = arith.addf %395, %396 : vector<8x32xf32>
    %398 = arith.addf %397, %385 : vector<8x32xf32>
    %399 = math.tanh %398 : vector<8x32xf32>
    %400 = arith.mulf %394, %399 : vector<8x32xf32>
    %401 = tpu.concatenate %400, %398 in 1 : vector<8x32xf32>, vector<8x32xf32> -> vector<8x64xf32>
    %402 = arith.index_cast %381 : i32 to index
    %c0_98 = arith.constant 0 : index
    %403 = vector.load %arg9[%402, %c0_98] : memref<128x64xf32, #tpu.memory_space<vmem>>, vector<8x64xf32>
    tpu.vector_store %arg9[%402, %c0_98], %401 {strides = array<i32>} : memref<128x64xf32, #tpu.memory_space<vmem>>, vector<8x64xf32>,
    %c16_i32 = arith.constant 16 : i32
    return
  }
  func.func @transform_0(%arg0: i32) -> (i32, i32) {
    %c0_i32 = arith.constant 0 : i32
    %c0_i32_0 = arith.constant 0 : i32
    %c0_i32_1 = arith.constant 0 : i32
    return %c0_i32, %c0_i32_0 : i32, i32
  }
  func.func @transform_1(%arg0: i32) -> (i32, i32) {
    %c0_i32 = arith.constant 0 : i32
    %c0_i32_0 = arith.constant 0 : i32
    %c0_i32_1 = arith.constant 0 : i32
    return %c0_i32, %c0_i32_0 : i32, i32
  }
  func.func @transform_2(%arg0: i32) -> (i32, i32) {
    %c0_i32 = arith.constant 0 : i32
    %c0_i32_0 = arith.constant 0 : i32
    %c0_i32_1 = arith.constant 0 : i32
    return %c0_i32, %c0_i32_0 : i32, i32
  }
  func.func @transform_3(%arg0: i32) -> (i32, i32) {
    %c0_i32 = arith.constant 0 : i32
    %c0_i32_0 = arith.constant 0 : i32
    %c0_i32_1 = arith.constant 0 : i32
    return %c0_i32, %c0_i32_0 : i32, i32
  }
  func.func @transform_4(%arg0: i32) -> (i32, i32) {
    %c0_i32 = arith.constant 0 : i32
    %c0_i32_0 = arith.constant 0 : i32
    %c0_i32_1 = arith.constant 0 : i32
    return %c0_i32, %c0_i32_0 : i32, i32
  }
  func.func @transform_5(%arg0: i32) -> (i32, i32) {
    %c0_i32 = arith.constant 0 : i32
    %c0_i32_0 = arith.constant 0 : i32
    %c0_i32_1 = arith.constant 0 : i32
    return %c0_i32, %c0_i32_0 : i32, i32
  }
  func.func @transform_6(%arg0: i32) -> (i32, i32) {
    %c0_i32 = arith.constant 0 : i32
    %c0_i32_0 = arith.constant 0 : i32
    %c0_i32_1 = arith.constant 0 : i32
    return %c0_i32, %c0_i32_0 : i32, i32
  }
  func.func @transform_7(%arg0: i32) -> (i32, i32) {
    %c0_i32 = arith.constant 0 : i32
    %c0_i32_0 = arith.constant 0 : i32
    %c0_i32_1 = arith.constant 0 : i32
    return %c0_i32, %c0_i32_0 : i32, i32
  }
  func.func @transform_8(%arg0: i32) -> (i32, i32) {
    %c0_i32 = arith.constant 0 : i32
    %c0_i32_0 = arith.constant 0 : i32
    %c0_i32_1 = arith.constant 0 : i32
    return %c0_i32, %c0_i32_0 : i32, i32
  }
}

</mosaic_0001>

<bundles_post_ra>
// kernel: mul.17
= control target key start
LH: loop header
LB: loop body
LE: loop exit
PB: predicated region body
PF: predicated region fallthrough
CT: control target
= control target key end

     0   :  { %s34_s0 = inlined_call_operand.vmem [shape: f32[128], index: 0, kind: input, shape index: {}]   ;;  %s35_s1 = inlined_call_operand.vmem [shape: f32[128], index: 1, kind: input, shape index: {}]   ;;  %s36_s2 = inlined_call_operand.vmem [shape: f32[128], index: 2, kind: output, shape index: {}]  }
   0x1   :  { %v3_v0 = vld [vmem:[%s34_s0] sm:$0x1] }
   0x2   :  { %v4_v1 = vld [vmem:[%s35_s1] sm:$0x1] }
   0x3   :  { %v7_v2 = vmul.f32 %v4_v1, %v3_v0 }
   0x5   :  { %9 = vst [vmem:[%s36_s2] sm:$0x1] %v7_v2 }

// kernel: sclstm_seq.1
= control target key start
LH: loop header
LB: loop body
LE: loop exit
PB: predicated region body
PF: predicated region fallthrough
CT: control target
= control target key end

     0   :  { %v2615_v3 = vmov 0.0|0.0   ;;  %v2616_v4 = vmov 0.0   ;;  %vm2617_vm0 = vmmov 0   ;;  %vm311_vm1 = vcmask 261120   ;;  %s2618_s21 = smov 64   ;;  %s2619_s24 = smov 32   ;;  %s3206_s1 = inlined_call_operand.vmem [shape: f32[48,160], index: 1, kind: input, shape index: {}]   ;;  %s3207_s2 = inlined_call_operand.vmem [shape: f32[32,128], index: 2, kind: input, shape index: {}]   ;;  %s3208_s6 = inlined_call_operand.vmem [shape: f32[8,32], index: 6, kind: input, shape index: {}]   ;;  %s3209_s0 = inlined_call_operand.vmem [shape: f32[128,48], index: 0, kind: input, shape index: {}]   ;;  %s3210_s3 = inlined_call_operand.vmem [shape: f32[1,160], index: 3, kind: input, shape index: {}]   ;;  %s3211_s4 = inlined_call_operand.vmem [shape: f32[1,128], index: 4, kind: input, shape index: {}]   ;;  %s3212_s5 = inlined_call_operand.vmem [shape: f32[1,128], index: 5, kind: input, shape index: {}]   ;;  %s3213_s7 = inlined_call_operand.vmem [shape: f32[8,32], index: 7, kind: input, shape index: {}]   ;;  %s3214_s8 = inlined_call_operand.vmem [shape: f32[128,64], index: 8, kind: output, shape index: {}]  }
   0x1   :  { %v46_v0 = vld [vmem:[%s3206_s1 + $0x8] sm:$0xff]  ;;  %v48_v1 = vld [vmem:[%s3206_s1 + $0x18] sm:$0xff]  ;;  %v45_v2 = vld [vmem:[%s3206_s1] sm:$0xff]  ;;  %2416 = vmatprep.subr.bf16.mxu1 %v2615_v3  ;;  %182 = vmatprep.mubr.f32.mxu0 %v2616_v4  ;;  %vm69_vm2 = vcmask 392192   ;;  %v59_v28 = vlaneseq  ;;  %vm458_vm3 = vcmask 523264  }
   0x2   :  { %v2404_v5 = vpack.c.bf16 %v48_v1, %v46_v0  ;;  %v47_v6 = vld [vmem:[%s3206_s1 + $0x10] sm:$0xff]  ;;  %v50_v7 = vld [vmem:[%s3206_s1 + $0x28] sm:$0xff]  ;;  %v52_v8 = vld [vmem:[%s3206_s1 + $0x38] sm:$0xff]  ;;  %2236 = vmatprep.mubr.msk.f32.mxu1 %vm2617_vm0, %v2616_v4 }
   0x3   :  { %v2406_v9 = vpack.c.bf16 %v47_v6, %v45_v2  ;;  %v2408_v10 = vpack.c.bf16 %v52_v8, %v50_v7  ;;  %v49_v11 = vld [vmem:[%s3206_s1 + $0x20] sm:$0xff]  ;;  %v51_v12 = vld [vmem:[%s3206_s1 + $0x30] sm:$0xff]  ;;  %v329_v14 = vld [vmem:[%s3207_s2 + $0x8] sm:$0xff]  ;;  %v60_v29 = vshrl.u32 %v59_v28, 7 }
   0x4   :  { %v328_v13 = vld [vmem:[%s3207_s2] sm:$0xff]  ;;  %2405 = vmatprep.subr.bf16.mxu0 %v2404_v5  ;;  %v54_v15 = vld [vmem:[%s3206_s1 + $0x48] sm:$0xff]  ;;  %v56_v16 = vld [vmem:[%s3206_s1 + $0x58] sm:$0xff]  ;;  %v2410_v17 = vpack.c.bf16 %v51_v12, %v49_v11 }
   0x5   :  { %2407 = vmatpush1.bf16.msra.mxu0 %v2406_v9  ;;  %v2705_v18 = vpack.c.bf16 %v329_v14, %v328_v13  ;;  %v330_v19 = vld [vmem:[%s3207_s2 + $0x10] sm:$0xff]  ;;  %v2412_v20 = vpack.c.bf16 %v56_v16, %v54_v15  ;;  %v53_v21 = vld [vmem:[%s3206_s1 + $0x40] sm:$0xff]  ;;  %v331_v23 = vld [vmem:[%s3207_s2 + $0x18] sm:$0xff]  ;;  %v61_v30 = vsub.s32 0, %v60_v29  ;;  %v65_v32 = vsub.s32 1, %v60_v29 }
   0x6   :  { %2409 = vmatprep.subr.bf16.mxu0 %v2408_v10  ;;  %v55_v22 = vld [vmem:[%s3206_s1 + $0x50] sm:$0xff]  ;;  %v2720_v24 = vpack.c.bf16 %v331_v23, %v330_v19  ;;  %v346_v26 = vld [vmem:[%s3208_s6] sm:$0xff]  ;;  %v30_v58 = vld [vmem:[%s3209_s0 + $0x8] sm:$0xff] }
   0x7   :  { %2418 = vmatpush3.bf16.msra.mxu1 %v2705_v18  ;;  %v2414_v25 = vpack.c.bf16 %v55_v22, %v53_v21  ;;  %v29_v27 = vld [vmem:[%s3209_s0] sm:$0xff]  ;;  %v31_v22 = vld [vmem:[%s3209_s0 + $0x10] sm:$0xff] }
   0x8   :  { %2419 = vmatprep.subr.bf16.mxu1 %v2615_v3  ;;  %v57_v31 = vld [vmem:[%s3210_s3] sm:$0x3] }
   0x9   :  { %2411 = vmatpush1.bf16.msra.mxu0 %v2410_v17  ;;  %v2748_v33 = vrot.slane %v57_v31, %v61_v30  ;;  %v2750_v34 = vrot.slane %v57_v31, %v65_v32  ;;  %v2757_v42 = vld [vmem:[%s3211_s4] ss:$0 sm:$0xff] }
   0xa   :  { %2413 = vmatprep.subr.bf16.mxu0 %v2412_v20  ;;  %v2763_v45 = vld [vmem:[%s3212_s5] ss:$0 sm:$0xff] }
   0xb   :  { %2421 = vmatpush3.bf16.msra.mxu1 %v2720_v24  ;;  %v347_v48 = vld [vmem:[%s3213_s7] sm:$0xff] }
   0xc   :  { %2422 = vmatprep.subr.bf16.mxu1 %v2615_v3 }
   0xd   :  { %2415 = vmatpush1.bf16.msra.mxu0 %v2414_v25 }
   0xe   :  { %2237 = vmatmul.mubr.msk.f32.vlgmr.msra.gmra.mrb[0].mxu1 %vm311_vm1, %v346_v26  ;;  %2470 = vmatprep.subr.bf16.mxu0 %v2615_v3 }
   0xf   :  { %2424 = vmatpush3.bf16.msra.mxu1 %v2705_v18  ;;  %2247 = vmatprep.mubr.msk.f32.mxu1 %vm2617_vm0, %v2616_v4 }
  0x10   :  { %2099 = vmatmul.mubr.msk.f32.vlgmr.msra.gmra.mrb[0].mxu0 %vm69_vm2, %v29_v27  ;;  %2425 = vmatprep.subr.bf16.mxu1 %v2615_v3 }
  0x11   :  { %188 = vmatprep.mubr.f32.mxu0 %v2616_v4  ;;  %2472 = vmatpush3.bf16.msra.mxu0 %v2705_v18 }
  0x12   :  { %2473 = vmatprep.subr.bf16.mxu0 %v2615_v3 }
  0x13   :  { %2427 = vmatpush3.bf16.msra.mxu1 %v2720_v24 }
  0x14   :  { %2428 = vmatprep.subr.bf16.mxu1 %v2615_v3  ;;  %2100 = vmatmul.mubr.msk.f32.gmra.mrb[2].mxu0 %vm69_vm2, %v30_v58 }
  0x15   :  { %2475 = vmatpush3.bf16.msra.mxu0 %v2720_v24  ;;  %194 = vmatprep.mubr.f32.mxu0 %v2616_v4 }
  0x16   :  { %2482 = vmatprep.subr.bf16.mxu0 %v2615_v3 }
  0x18   :  { %2101 = vmatmul.mubr.msk.f32.gmra.mrb[4].mxu0 %vm69_vm2, %v31_v22 }
  0x19   :  { %200 = vmatprep.mubr.f32.mxu0 %v2616_v4 }
  0xe1   :  { %v419_v35 = vpop.f32.mrb[0].mxu1 }
  0xe2   :  { %v2238_v36 = vpop.f32.mrb[1].mxu1 }
  0xe3   :  { %v184_v37 = vpop.f32.mrb[0].mxu0 }
  0xe4   :  { %v185_v38 = vadd.f32 %v184_v37, %v2748_v33  ;;  %v186_v39 = vpop.f32.mrb[1].mxu0 }
  0xe5   :  { %v187_v40 = vadd.f32 %v186_v39, %v2750_v34 }
  0xe6   :  { %v423_v41 = vadd.f32 %v419_v35, %v185_v38 }
  0xe7   :  { %2517 = vtanh.f32 %v187_v40  ;;  %v190_v62 = vpop.f32.mrb[2].mxu0 }
  0xe8   :  { %2519 = vtanh.f32 %v423_v41  ;;  %v192_v63 = vpop.f32.mrb[3].mxu0  ;;  %v191_v6 = vadd.f32 %v190_v62, %v2748_v33 }
  0xe9   :  { %v193_v0 = vadd.f32 %v192_v63, %v2750_v34 }
  0xeb   :  { %v196_v27 = vpop.f32.mrb[4].mxu0 }
  0xec   :  { %v198_v28 = vpop.f32.mrb[5].mxu0  ;;  %v197_v35 = vadd.f32 %v196_v27, %v2748_v33 }
  0xed   :  { %v199_v29 = vadd.f32 %v198_v28, %v2750_v34 }
  0xf1   :  { %v2518_v43 = vpop.eup %2517 }
  0xf2   :  { %v2520_v44 = vpop.eup %2519  ;;  %312 = vst.msk [vmem:[#allocation3] sm:$0xff] %vm311_vm1, %v2518_v43 }
  0xf3   :  { %v425_v46 = vmul.f32 %v2520_v44, %v2757_v42 }
  0xf5   :  { %v426_v47 = vadd.f32 %v2763_v45, %v425_v46 }
  0xf7   :  { %433 = vrot.lane.b32.xlu0 %v426_v47, %s2618_s21 }
  0xf9   :  { %v349_v51 = vld [vmem:[#allocation3] sm:$0xff] }
  0xfb   :  { %428 = vrot.lane.b32.xlu0 %v347_v48, %s2619_s24 }
 0x169   :  { %v434_v49 = vpop.permute.xlu0 %433 }
 0x16a   :  { %v436_v50 = vmul.f32 %v434_v49, %v426_v47 }
 0x16c   :  { %438 = vrot.lane.b32.xlu1 %v436_v50, %s2619_s24 }
 0x16d   :  { %v429_v52 = vpop.permute.xlu0 %428 }
 0x16e   :  { %v431_v54 = vmul.f32 %v429_v52, %v426_v47  ;;  %v32_v52 = vld [vmem:[%s3209_s0 + $0x18] sm:$0xff] }
 0x16f   :  { %2102 = vmatmul.mubr.msk.f32.gmra.mrb[6].mxu0 %vm69_vm2, %v32_v52 }
 0x170   :  { %443 = vrot.lane.b32.xlu1 %v349_v51, %s2619_s24  ;;  %206 = vmatprep.mubr.f32.mxu0 %v2616_v4 }
 0x1de   :  { %v439_v53 = vpop.permute.xlu1 %438 }
 0x1df   :  { %v441_v55 = vadd.f32 %v439_v53, %v431_v54 }
 0x1e2   :  { %v444_v56 = vpop.permute.xlu1 %443 }
 0x1e3   :  { %v446_v57 = vadd.f32 %v444_v56, %v441_v55 }
 0x1e5   :  { %2521 = vtanh.f32 %v446_v57 }
 0x1e6   :  { %2523 = vtanh.f32 %v193_v0 }
 0x1ef   :  { %v2522_v59 = vpop.eup %2521 }
 0x1f0   :  { %449 = vrot.lane.b32.xlu0 %v2522_v59, %s2618_s21  ;;  %v2524_v1 = vpop.eup %2523 }
 0x1f1   :  { %313 = vst.msk [vmem:[#allocation3 + $0x8] sm:$0xff] %vm311_vm1, %v2524_v1 }
 0x1f8   :  { %v463_v13 = vld [vmem:[#allocation3 + $0x8] sm:$0xff] }
 0x242   :  { %v202_v56 = vpop.f32.mrb[6].mxu0 }
 0x243   :  { %v203_v62 = vadd.f32 %v202_v56, %v2748_v33 }
 0x262   :  { %v450_v60 = vpop.permute.xlu0 %449 }
 0x263   :  { %v452_v61 = vmul.f32 %v450_v60, %v426_v47 }
 0x265   :  { %454 = vrot.lane.b32.xlu1 %v452_v61, %s2619_s24 }
 0x2d7   :  { %v455_v2 = vpop.permute.xlu1 %454 }
 0x2d8   :  { %v457_v5 = vsel %vm311_vm1, %v455_v2, %v446_v57  ;;  %2248 = vmatmul.mubr.msk.f32.vlgmr.msra.gmra.mrb[2].mxu1 %vm311_vm1, %v455_v2 }
 0x2d9   :  { %459 = vst.msk [vmem:[%s3214_s8] sm:$0xff] %vm458_vm3, %v457_v5  ;;  %2430 = vmatpush3.bf16.msra.mxu1 %v2705_v18  ;;  %2258 = vmatprep.mubr.msk.f32.mxu1 %vm2617_vm0, %v2616_v4 }
 0x2da   :  { %2431 = vmatprep.subr.bf16.mxu1 %v2615_v3 }
 0x2dd   :  { %2433 = vmatpush3.bf16.msra.mxu1 %v2720_v24 }
 0x2de   :  { %2434 = vmatprep.subr.bf16.mxu1 %v2615_v3 }
 0x3ab   :  { %v532_v7 = vpop.f32.mrb[2].mxu1 }
 0x3ac   :  { %v536_v8 = vadd.f32 %v532_v7, %v191_v6  ;;  %v2249_v9 = vpop.f32.mrb[3].mxu1 }
 0x3ae   :  { %2525 = vtanh.f32 %v536_v8 }
 0x3b8   :  { %v2526_v10 = vpop.eup %2525 }
 0x3b9   :  { %v538_v11 = vmul.f32 %v2526_v10, %v2757_v42 }
 0x3bb   :  { %v539_v12 = vadd.f32 %v2763_v45, %v538_v11 }
 0x3bd   :  { %542 = vrot.lane.b32.xlu0 %v539_v12, %s2618_s21  ;;  %v540_v16 = vmul.f32 %v539_v12, %v446_v57  ;;  %v204_v57 = vpop.f32.mrb[7].mxu0 }
 0x3be   :  { %v205_v58 = vadd.f32 %v204_v57, %v2750_v34 }
 0x3c1   :  { %552 = vrot.lane.b32.xlu0 %v463_v13, %s2619_s24 }
 0x42f   :  { %v543_v14 = vpop.permute.xlu0 %542 }
 0x430   :  { %v545_v15 = vmul.f32 %v543_v14, %v539_v12 }
 0x432   :  { %547 = vrot.lane.b32.xlu1 %v545_v15, %s2619_s24  ;;  %v33_v15 = vld [vmem:[%s3209_s0 + $0x20] sm:$0xff] }
 0x433   :  { %v553_v20 = vpop.permute.xlu0 %552  ;;  %2103 = vmatmul.mubr.msk.f32.gmra.mrb[8].mxu0 %vm69_vm2, %v33_v15 }
 0x434   :  { %212 = vmatprep.mubr.f32.mxu0 %v2616_v4 }
 0x4a4   :  { %v548_v17 = vpop.permute.xlu1 %547 }
 0x4a5   :  { %v550_v19 = vadd.f32 %v548_v17, %v540_v16 }
 0x4a7   :  { %v555_v21 = vadd.f32 %v553_v20, %v550_v19 }
 0x4a9   :  { %2527 = vtanh.f32 %v555_v21 }
 0x4aa   :  { %2529 = vtanh.f32 %v199_v29 }
 0x4b3   :  { %v2528_v23 = vpop.eup %2527 }
 0x4b4   :  { %558 = vrot.lane.b32.xlu1 %v2528_v23, %s2618_s21  ;;  %v2530_v30 = vpop.eup %2529 }
 0x4b5   :  { %314 = vst.msk [vmem:[#allocation3 + $0x10] sm:$0xff] %vm311_vm1, %v2530_v30 }
 0x4bc   :  { %v572_v43 = vld [vmem:[#allocation3 + $0x10] sm:$0xff] }
 0x506   :  { %v208_v20 = vpop.f32.mrb[8].mxu0 }
 0x507   :  { %v209_v27 = vadd.f32 %v208_v20, %v2748_v33 }
 0x526   :  { %v559_v25 = vpop.permute.xlu1 %558 }
 0x527   :  { %v561_v26 = vmul.f32 %v559_v25, %v539_v12 }
 0x529   :  { %563 = vrot.lane.b32.xlu0 %v561_v26, %s2619_s24 }
 0x59b   :  { %v564_v31 = vpop.permute.xlu0 %563 }
 0x59c   :  { %v566_v32 = vsel %vm311_vm1, %v564_v31, %v555_v21  ;;  %2259 = vmatmul.mubr.msk.f32.vlgmr.msra.gmra.mrb[4].mxu1 %vm311_vm1, %v564_v31 }
 0x59d   :  { %2119 = vst.msk [vmem:[%s3214_s8 + $0x8] sm:$0xff] %vm458_vm3, %v566_v32  ;;  %2436 = vmatpush3.bf16.msra.mxu1 %v2705_v18  ;;  %2269 = vmatprep.mubr.msk.f32.mxu1 %vm2617_vm0, %v2616_v4 }
 0x59e   :  { %2437 = vmatprep.subr.bf16.mxu1 %v2615_v3 }
 0x5a1   :  { %2439 = vmatpush3.bf16.msra.mxu1 %v2720_v24 }
 0x5a2   :  { %2440 = vmatprep.subr.bf16.mxu1 %v2615_v3 }
 0x66f   :  { %v641_v36 = vpop.f32.mrb[4].mxu1 }
 0x670   :  { %v645_v37 = vadd.f32 %v641_v36, %v197_v35  ;;  %v2260_v38 = vpop.f32.mrb[5].mxu1 }
 0x672   :  { %2531 = vtanh.f32 %v645_v37 }
 0x67c   :  { %v2532_v39 = vpop.eup %2531 }
 0x67d   :  { %v647_v40 = vmul.f32 %v2532_v39, %v2757_v42 }
 0x67f   :  { %v648_v41 = vadd.f32 %v2763_v45, %v647_v40 }
 0x681   :  { %651 = vrot.lane.b32.xlu1 %v648_v41, %s2618_s21  ;;  %v649_v47 = vmul.f32 %v648_v41, %v555_v21  ;;  %v210_v21 = vpop.f32.mrb[9].mxu0 }
 0x682   :  { %v211_v22 = vadd.f32 %v210_v21, %v2750_v34 }
 0x685   :  { %661 = vrot.lane.b32.xlu1 %v572_v43, %s2619_s24 }
 0x6f3   :  { %v652_v44 = vpop.permute.xlu1 %651 }
 0x6f4   :  { %v654_v46 = vmul.f32 %v652_v44, %v648_v41 }
 0x6f6   :  { %656 = vrot.lane.b32.xlu0 %v654_v46, %s2619_s24  ;;  %v34_v46 = vld [vmem:[%s3209_s0 + $0x28] sm:$0xff] }
 0x6f7   :  { %v662_v50 = vpop.permute.xlu1 %661  ;;  %2104 = vmatmul.mubr.msk.f32.gmra.mrb[10].mxu0 %vm69_vm2, %v34_v46 }
 0x6f8   :  { %218 = vmatprep.mubr.f32.mxu0 %v2616_v4 }
 0x768   :  { %v657_v48 = vpop.permute.xlu0 %656 }
 0x769   :  { %v659_v49 = vadd.f32 %v657_v48, %v649_v47 }
 0x76b   :  { %v664_v51 = vadd.f32 %v662_v50, %v659_v49 }
 0x76d   :  { %2533 = vtanh.f32 %v664_v51 }
 0x76e   :  { %2535 = vtanh.f32 %v205_v58 }
 0x777   :  { %v2534_v53 = vpop.eup %2533 }
 0x778   :  { %667 = vrot.lane.b32.xlu0 %v2534_v53, %s2618_s21  ;;  %v2536_v59 = vpop.eup %2535 }
 0x779   :  { %315 = vst.msk [vmem:[#allocation3 + $0x18] sm:$0xff] %vm311_vm1, %v2536_v59 }
 0x780   :  { %v681_v7 = vld [vmem:[#allocation3 + $0x18] sm:$0xff] }
 0x7ca   :  { %v214_v50 = vpop.f32.mrb[10].mxu0 }
 0x7cb   :  { %v215_v56 = vadd.f32 %v214_v50, %v2748_v33 }
 0x7ea   :  { %v668_v54 = vpop.permute.xlu0 %667 }
 0x7eb   :  { %v670_v55 = vmul.f32 %v668_v54, %v648_v41 }
 0x7ed   :  { %672 = vrot.lane.b32.xlu1 %v670_v55, %s2619_s24 }
 0x85f   :  { %v673_v60 = vpop.permute.xlu1 %672 }
 0x860   :  { %v675_v61 = vsel %vm311_vm1, %v673_v60, %v664_v51  ;;  %2270 = vmatmul.mubr.msk.f32.vlgmr.msra.gmra.mrb[6].mxu1 %vm311_vm1, %v673_v60 }
 0x861   :  { %2121 = vst.msk [vmem:[%s3214_s8 + $0x10] sm:$0xff] %vm458_vm3, %v675_v61  ;;  %2442 = vmatpush3.bf16.msra.mxu1 %v2705_v18  ;;  %2280 = vmatprep.mubr.msk.f32.mxu1 %vm2617_vm0, %v2616_v4 }
 0x862   :  { %2443 = vmatprep.subr.bf16.mxu1 %v2615_v3 }
 0x865   :  { %2445 = vmatpush3.bf16.msra.mxu1 %v2720_v24 }
 0x866   :  { %2446 = vmatprep.subr.bf16.mxu1 %v2615_v3 }
 0x933   :  { %v750_v63 = vpop.f32.mrb[6].mxu1 }
 0x934   :  { %v754_v0 = vadd.f32 %v750_v63, %v203_v62  ;;  %v2271_v1 = vpop.f32.mrb[7].mxu1 }
 0x936   :  { %2537 = vtanh.f32 %v754_v0 }
 0x940   :  { %v2538_v2 = vpop.eup %2537 }
 0x941   :  { %v756_v5 = vmul.f32 %v2538_v2, %v2757_v42 }
 0x943   :  { %v757_v6 = vadd.f32 %v2763_v45, %v756_v5 }
 0x945   :  { %760 = vrot.lane.b32.xlu0 %v757_v6, %s2618_s21  ;;  %v758_v10 = vmul.f32 %v757_v6, %v664_v51  ;;  %v216_v51 = vpop.f32.mrb[11].mxu0 }
 0x946   :  { %v217_v52 = vadd.f32 %v216_v51, %v2750_v34 }
 0x949   :  { %770 = vrot.lane.b32.xlu0 %v681_v7, %s2619_s24 }
 0x9b7   :  { %v761_v8 = vpop.permute.xlu0 %760 }
 0x9b8   :  { %v763_v9 = vmul.f32 %v761_v8, %v757_v6 }
 0x9ba   :  { %765 = vrot.lane.b32.xlu1 %v763_v9, %s2619_s24  ;;  %v35_v9 = vld [vmem:[%s3209_s0 + $0x30] sm:$0xff] }
 0x9bb   :  { %v771_v13 = vpop.permute.xlu0 %770  ;;  %2105 = vmatmul.mubr.msk.f32.gmra.mrb[12].mxu0 %vm69_vm2, %v35_v9 }
 0x9bc   :  { %224 = vmatprep.mubr.f32.mxu0 %v2616_v4 }
 0xa2c   :  { %v766_v11 = vpop.permute.xlu1 %765 }
 0xa2d   :  { %v768_v12 = vadd.f32 %v766_v11, %v758_v10 }
 0xa2f   :  { %v773_v14 = vadd.f32 %v771_v13, %v768_v12 }
 0xa31   :  { %2539 = vtanh.f32 %v773_v14 }
 0xa32   :  { %2541 = vtanh.f32 %v211_v22 }
 0xa3b   :  { %v2540_v16 = vpop.eup %2539 }
 0xa3c   :  { %776 = vrot.lane.b32.xlu1 %v2540_v16, %s2618_s21  ;;  %v2542_v23 = vpop.eup %2541 }
 0xa3d   :  { %316 = vst.msk [vmem:[#allocation3 + $0x20] sm:$0xff] %vm311_vm1, %v2542_v23 }
 0xa44   :  { %v790_v36 = vld [vmem:[#allocation3 + $0x20] sm:$0xff] }
 0xa8e   :  { %v220_v13 = vpop.f32.mrb[12].mxu0 }
 0xa8f   :  { %v221_v20 = vadd.f32 %v220_v13, %v2748_v33 }
 0xaae   :  { %v777_v17 = vpop.permute.xlu1 %776 }
 0xaaf   :  { %v779_v19 = vmul.f32 %v777_v17, %v757_v6 }
 0xab1   :  { %781 = vrot.lane.b32.xlu0 %v779_v19, %s2619_s24 }
 0xb23   :  { %v782_v25 = vpop.permute.xlu0 %781 }
 0xb24   :  { %v784_v26 = vsel %vm311_vm1, %v782_v25, %v773_v14  ;;  %2281 = vmatmul.mubr.msk.f32.vlgmr.msra.gmra.mrb[8].mxu1 %vm311_vm1, %v782_v25 }
 0xb25   :  { %2123 = vst.msk [vmem:[%s3214_s8 + $0x18] sm:$0xff] %vm458_vm3, %v784_v26  ;;  %2448 = vmatpush3.bf16.msra.mxu1 %v2705_v18  ;;  %2291 = vmatprep.mubr.msk.f32.mxu1 %vm2617_vm0, %v2616_v4 }
 0xb26   :  { %2449 = vmatprep.subr.bf16.mxu1 %v2615_v3 }
 0xb29   :  { %2451 = vmatpush3.bf16.msra.mxu1 %v2720_v24 }
 0xb2a   :  { %2452 = vmatprep.subr.bf16.mxu1 %v2615_v3 }
 0xbf7   :  { %v859_v28 = vpop.f32.mrb[8].mxu1 }
 0xbf8   :  { %v863_v29 = vadd.f32 %v859_v28, %v209_v27  ;;  %v2282_v30 = vpop.f32.mrb[9].mxu1 }
 0xbfa   :  { %2543 = vtanh.f32 %v863_v29 }
 0xc04   :  { %v2544_v31 = vpop.eup %2543 }
 0xc05   :  { %v865_v32 = vmul.f32 %v2544_v31, %v2757_v42 }
 0xc07   :  { %v866_v35 = vadd.f32 %v2763_v45, %v865_v32 }
 0xc09   :  { %869 = vrot.lane.b32.xlu1 %v866_v35, %s2618_s21  ;;  %v867_v39 = vmul.f32 %v866_v35, %v773_v14  ;;  %v222_v14 = vpop.f32.mrb[13].mxu0 }
 0xc0a   :  { %v223_v15 = vadd.f32 %v222_v14, %v2750_v34 }
 0xc0d   :  { %879 = vrot.lane.b32.xlu1 %v790_v36, %s2619_s24 }
 0xc7b   :  { %v870_v37 = vpop.permute.xlu1 %869 }
 0xc7c   :  { %v872_v38 = vmul.f32 %v870_v37, %v866_v35 }
 0xc7e   :  { %874 = vrot.lane.b32.xlu0 %v872_v38, %s2619_s24  ;;  %v36_v38 = vld [vmem:[%s3209_s0 + $0x38] sm:$0xff] }
 0xc7f   :  { %v880_v43 = vpop.permute.xlu1 %879  ;;  %2106 = vmatmul.mubr.msk.f32.gmra.mrb[14].mxu0 %vm69_vm2, %v36_v38  ;;  %v43_v38 = vld [vmem:[%s3209_s0 + $0x70] sm:$0xff] }
 0xc80   :  { %230 = vmatprep.mubr.f32.mxu0 %v2616_v4 }
 0xcf0   :  { %v875_v40 = vpop.permute.xlu0 %874 }
 0xcf1   :  { %v877_v41 = vadd.f32 %v875_v40, %v867_v39 }
 0xcf3   :  { %v882_v44 = vadd.f32 %v880_v43, %v877_v41 }
 0xcf5   :  { %2545 = vtanh.f32 %v882_v44 }
 0xcf6   :  { %2547 = vtanh.f32 %v217_v52 }
 0xcff   :  { %v2546_v47 = vpop.eup %2545 }
 0xd00   :  { %885 = vrot.lane.b32.xlu0 %v2546_v47, %s2618_s21  ;;  %v2548_v53 = vpop.eup %2547 }
 0xd01   :  { %317 = vst.msk [vmem:[#allocation3 + $0x28] sm:$0xff] %vm311_vm1, %v2548_v53 }
 0xd08   :  { %v899_v63 = vld [vmem:[#allocation3 + $0x28] sm:$0xff] }
 0xd52   :  { %v226_v43 = vpop.f32.mrb[14].mxu0 }
 0xd53   :  { %v227_v50 = vadd.f32 %v226_v43, %v2748_v33 }
 0xd72   :  { %v886_v48 = vpop.permute.xlu0 %885 }
 0xd73   :  { %v888_v49 = vmul.f32 %v886_v48, %v866_v35 }
 0xd75   :  { %890 = vrot.lane.b32.xlu1 %v888_v49, %s2619_s24 }
 0xde7   :  { %v891_v54 = vpop.permute.xlu1 %890 }
 0xde8   :  { %v893_v55 = vsel %vm311_vm1, %v891_v54, %v882_v44  ;;  %2292 = vmatmul.mubr.msk.f32.vlgmr.msra.gmra.mrb[10].mxu1 %vm311_vm1, %v891_v54 }
 0xde9   :  { %2125 = vst.msk [vmem:[%s3214_s8 + $0x20] sm:$0xff] %vm458_vm3, %v893_v55  ;;  %2454 = vmatpush3.bf16.msra.mxu1 %v2705_v18  ;;  %2302 = vmatprep.mubr.msk.f32.mxu1 %vm2617_vm0, %v2616_v4 }
 0xdea   :  { %2455 = vmatprep.subr.bf16.mxu1 %v2615_v3 }
 0xded   :  { %2457 = vmatpush3.bf16.msra.mxu1 %v2720_v24 }
 0xdee   :  { %2458 = vmatprep.subr.bf16.mxu1 %v2615_v3 }
 0xebb   :  { %v968_v57 = vpop.f32.mrb[10].mxu1 }
 0xebc   :  { %v972_v58 = vadd.f32 %v968_v57, %v215_v56  ;;  %v2293_v59 = vpop.f32.mrb[11].mxu1 }
 0xebe   :  { %2549 = vtanh.f32 %v972_v58 }
 0xec8   :  { %v2550_v60 = vpop.eup %2549 }
 0xec9   :  { %v974_v61 = vmul.f32 %v2550_v60, %v2757_v42 }
 0xecb   :  { %v975_v62 = vadd.f32 %v2763_v45, %v974_v61 }
 0xecd   :  { %978 = vrot.lane.b32.xlu0 %v975_v62, %s2618_s21  ;;  %v976_v2 = vmul.f32 %v975_v62, %v882_v44  ;;  %v228_v44 = vpop.f32.mrb[15].mxu0 }
 0xece   :  { %v229_v46 = vadd.f32 %v228_v44, %v2750_v34 }
 0xed1   :  { %988 = vrot.lane.b32.xlu0 %v899_v63, %s2619_s24 }
 0xf3f   :  { %v979_v0 = vpop.permute.xlu0 %978 }
 0xf40   :  { %v981_v1 = vmul.f32 %v979_v0, %v975_v62 }
 0xf42   :  { %983 = vrot.lane.b32.xlu1 %v981_v1, %s2619_s24  ;;  %v37_v1 = vld [vmem:[%s3209_s0 + $0x40] sm:$0xff] }
 0xf43   :  { %v989_v7 = vpop.permute.xlu0 %988  ;;  %2107 = vmatmul.mubr.msk.f32.gmra.mrb[16].mxu0 %vm69_vm2, %v37_v1 }
 0xf44   :  { %236 = vmatprep.mubr.f32.mxu0 %v2616_v4 }
 0xfb4   :  { %v984_v5 = vpop.permute.xlu1 %983 }
 0xfb5   :  { %v986_v6 = vadd.f32 %v984_v5, %v976_v2 }
 0xfb7   :  { %v991_v8 = vadd.f32 %v989_v7, %v986_v6 }
 0xfb9   :  { %2551 = vtanh.f32 %v991_v8 }
 0xfba   :  { %2553 = vtanh.f32 %v223_v15 }
 0xfc3   :  { %v2552_v10 = vpop.eup %2551 }
 0xfc4   :  { %994 = vrot.lane.b32.xlu1 %v2552_v10, %s2618_s21  ;;  %v2554_v16 = vpop.eup %2553 }
 0xfc5   :  { %318 = vst.msk [vmem:[#allocation3 + $0x30] sm:$0xff] %vm311_vm1, %v2554_v16 }
 0xfcc   :  { %v1008_v28 = vld [vmem:[#allocation3 + $0x30] sm:$0xff] }
0x1016   :  { %v232_v7 = vpop.f32.mrb[16].mxu0 }
0x1017   :  { %v233_v13 = vadd.f32 %v232_v7, %v2748_v33 }
0x1036   :  { %v995_v11 = vpop.permute.xlu1 %994 }
0x1037   :  { %v997_v12 = vmul.f32 %v995_v11, %v975_v62 }
0x1039   :  { %999 = vrot.lane.b32.xlu0 %v997_v12, %s2619_s24 }
0x10ab   :  { %v1000_v17 = vpop.permute.xlu0 %999 }
0x10ac   :  { %v1002_v19 = vsel %vm311_vm1, %v1000_v17, %v991_v8  ;;  %2303 = vmatmul.mubr.msk.f32.vlgmr.msra.gmra.mrb[12].mxu1 %vm311_vm1, %v1000_v17 }
0x10ad   :  { %2127 = vst.msk [vmem:[%s3214_s8 + $0x28] sm:$0xff] %vm458_vm3, %v1002_v19  ;;  %2460 = vmatpush3.bf16.msra.mxu1 %v2705_v18  ;;  %2313 = vmatprep.mubr.msk.f32.mxu1 %vm2617_vm0, %v2616_v4 }
0x10ae   :  { %2461 = vmatprep.subr.bf16.mxu1 %v2615_v3 }
0x10b1   :  { %2463 = vmatpush3.bf16.msra.mxu1 %v2720_v24 }
0x10b2   :  { %2464 = vmatprep.subr.bf16.mxu1 %v2615_v3 }
0x117f   :  { %v1077_v21 = vpop.f32.mrb[12].mxu1 }
0x1180   :  { %v1081_v22 = vadd.f32 %v1077_v21, %v221_v20  ;;  %v2304_v23 = vpop.f32.mrb[13].mxu1 }
0x1182   :  { %2555 = vtanh.f32 %v1081_v22 }
0x118c   :  { %v2556_v25 = vpop.eup %2555 }
0x118d   :  { %v1083_v26 = vmul.f32 %v2556_v25, %v2757_v42 }
0x118f   :  { %v1084_v27 = vadd.f32 %v2763_v45, %v1083_v26 }
0x1191   :  { %1087 = vrot.lane.b32.xlu1 %v1084_v27, %s2618_s21  ;;  %v1085_v31 = vmul.f32 %v1084_v27, %v991_v8  ;;  %v234_v8 = vpop.f32.mrb[17].mxu0 }
0x1192   :  { %v235_v9 = vadd.f32 %v234_v8, %v2750_v34 }
0x1195   :  { %1097 = vrot.lane.b32.xlu1 %v1008_v28, %s2619_s24 }
0x1203   :  { %v1088_v29 = vpop.permute.xlu1 %1087 }
0x1204   :  { %v1090_v30 = vmul.f32 %v1088_v29, %v1084_v27 }
0x1206   :  { %1092 = vrot.lane.b32.xlu0 %v1090_v30, %s2619_s24  ;;  %v38_v30 = vld [vmem:[%s3209_s0 + $0x48] sm:$0xff] }
0x1207   :  { %v1098_v36 = vpop.permute.xlu1 %1097  ;;  %2108 = vmatmul.mubr.msk.f32.gmra.mrb[18].mxu0 %vm69_vm2, %v38_v30 }
0x1208   :  { %242 = vmatprep.mubr.f32.mxu0 %v2616_v4 }
0x1278   :  { %v1093_v32 = vpop.permute.xlu0 %1092 }
0x1279   :  { %v1095_v35 = vadd.f32 %v1093_v32, %v1085_v31  ;;  %v39_v31 = vld [vmem:[%s3209_s0 + $0x50] sm:$0xff]  ;;  %v40_v32 = vld [vmem:[%s3209_s0 + $0x58] sm:$0xff] }
0x127a   :  { %2109 = vmatmul.mubr.msk.f32.gmra.mrb[20].mxu0 %vm69_vm2, %v39_v31 }
0x127b   :  { %v1100_v37 = vadd.f32 %v1098_v36, %v1095_v35  ;;  %248 = vmatprep.mubr.f32.mxu0 %v2616_v4  ;;  %v41_v36 = vld [vmem:[%s3209_s0 + $0x60] sm:$0xff] }
0x127d   :  { %2557 = vtanh.f32 %v1100_v37 }
0x127e   :  { %2559 = vtanh.f32 %v229_v46  ;;  %2110 = vmatmul.mubr.msk.f32.gmra.mrb[22].mxu0 %vm69_vm2, %v40_v32 }
0x127f   :  { %254 = vmatprep.mubr.f32.mxu0 %v2616_v4 }
0x1282   :  { %2111 = vmatmul.mubr.msk.f32.gmra.mrb[24].mxu0 %vm69_vm2, %v41_v36 }
0x1283   :  { %260 = vmatprep.mubr.f32.mxu0 %v2616_v4 }
0x1287   :  { %v2558_v39 = vpop.eup %2557 }
0x1288   :  { %1103 = vrot.lane.b32.xlu0 %v2558_v39, %s2618_s21  ;;  %v2560_v47 = vpop.eup %2559  ;;  %v44_v39 = vld [vmem:[%s3209_s0 + $0x78] sm:$0xff] }
0x1289   :  { %319 = vst.msk [vmem:[#allocation3 + $0x38] sm:$0xff] %vm311_vm1, %v2560_v47 }
0x1290   :  { %v1117_v57 = vld [vmem:[#allocation3 + $0x38] sm:$0xff] }
0x12da   :  { %v238_v43 = vpop.f32.mrb[18].mxu0 }
0x12db   :  { %v240_v44 = vpop.f32.mrb[19].mxu0 }
0x12dc   :  { %v241_v46 = vadd.f32 %v240_v44, %v2750_v34 }
0x12fa   :  { %v1104_v40 = vpop.permute.xlu0 %1103 }
0x12fb   :  { %v1106_v41 = vmul.f32 %v1104_v40, %v1084_v27 }
0x12fd   :  { %1108 = vrot.lane.b32.xlu1 %v1106_v41, %s2619_s24 }
0x134d   :  { %v3032_v47 = vpop.f32.mrb[20].mxu0 }
0x136f   :  { %v1109_v48 = vpop.permute.xlu1 %1108 }
0x1370   :  { %v1111_v49 = vsel %vm311_vm1, %v1109_v48, %v1100_v37  ;;  %2314 = vmatmul.mubr.msk.f32.vlgmr.msra.gmra.mrb[14].mxu1 %vm311_vm1, %v1109_v48  ;;  %v246_v48 = vpop.f32.mrb[21].mxu0 }
0x1371   :  { %2129 = vst.msk [vmem:[%s3214_s8 + $0x30] sm:$0xff] %vm458_vm3, %v1111_v49  ;;  %2466 = vmatpush3.bf16.msra.mxu1 %v2705_v18  ;;  %2324 = vmatprep.mubr.msk.f32.mxu1 %vm2617_vm0, %v2616_v4  ;;  %v247_v49 = vadd.f32 %v246_v48, %v2750_v34 }
0x1372   :  { %2467 = vmatprep.subr.bf16.mxu1 %v2615_v3 }
0x1375   :  { %2469 = vmatpush3.bf16.msra.mxu1 %v2720_v24 }
0x1376   :  { %2476 = vmatprep.subr.bf16.mxu1 %v2615_v3 }
0x1443   :  { %v1186_v51 = vpop.f32.mrb[14].mxu1 }
0x1444   :  { %v1190_v52 = vadd.f32 %v1186_v51, %v227_v50  ;;  %v2315_v53 = vpop.f32.mrb[15].mxu1  ;;  %v3035_v50 = vpop.f32.mrb[22].mxu0 }
0x1445   :  { %v252_v51 = vpop.f32.mrb[23].mxu0 }
0x1446   :  { %2561 = vtanh.f32 %v1190_v52  ;;  %v253_v52 = vadd.f32 %v252_v51, %v2750_v34  ;;  %v3038_v53 = vpop.f32.mrb[24].mxu0 }
0x1450   :  { %v2562_v54 = vpop.eup %2561 }
0x1451   :  { %v1192_v55 = vmul.f32 %v2562_v54, %v2757_v42  ;;  %v258_v54 = vpop.f32.mrb[25].mxu0 }
0x1453   :  { %v1193_v56 = vadd.f32 %v2763_v45, %v1192_v55 }
0x1455   :  { %1196 = vrot.lane.b32.xlu0 %v1193_v56, %s2618_s21  ;;  %v1194_v60 = vmul.f32 %v1193_v56, %v1100_v37  ;;  %v42_v37 = vld [vmem:[%s3209_s0 + $0x68] sm:$0xff] }
0x1456   :  { %2112 = vmatmul.mubr.msk.f32.gmra.mrb[26].mxu0 %vm69_vm2, %v42_v37 }
0x1457   :  { %266 = vmatprep.mubr.f32.mxu0 %v2616_v4 }
0x1459   :  { %1206 = vrot.lane.b32.xlu0 %v1117_v57, %s2619_s24 }
0x145a   :  { %2113 = vmatmul.mubr.msk.f32.gmra.mrb[28].mxu0 %vm69_vm2, %v43_v38 }
0x145b   :  { %272 = vmatprep.mubr.f32.mxu0 %v2616_v4 }
0x145e   :  { %2114 = vmatmul.mubr.msk.f32.gmra.mrb[30].mxu0 %vm69_vm2, %v44_v39 }
0x145f   :  { %2335 = vmatprep.mubr.msk.f32.mxu0 %vm2617_vm0, %v2616_v4 }
0x14c7   :  { %v1197_v58 = vpop.permute.xlu0 %1196 }
0x14c8   :  { %v1199_v59 = vmul.f32 %v1197_v58, %v1193_v56 }
0x14ca   :  { %1201 = vrot.lane.b32.xlu1 %v1199_v59, %s2619_s24 }
0x14cb   :  { %v1207_v63 = vpop.permute.xlu0 %1206 }
0x1529   :  { %v3042_v57 = vpop.f32.mrb[26].mxu0 }
0x152a   :  { %v264_v58 = vpop.f32.mrb[27].mxu0 }
0x153c   :  { %v1202_v61 = vpop.permute.xlu1 %1201 }
0x153d   :  { %v1204_v62 = vadd.f32 %v1202_v61, %v1194_v60  ;;  %v265_v60 = vadd.f32 %v264_v58, %v2750_v34  ;;  %v3046_v61 = vpop.f32.mrb[28].mxu0  ;;  %v251_v58 = vadd.f32 %v3035_v50, %v2748_v33 }
0x153f   :  { %v1209_v0 = vadd.f32 %v1207_v63, %v1204_v62  ;;  %v270_v62 = vpop.f32.mrb[29].mxu0 }
0x1540   :  { %v3050_v1 = vpop.f32.mrb[30].mxu0 }
0x1541   :  { %2563 = vtanh.f32 %v1209_v0 }
0x1542   :  { %2565 = vtanh.f32 %v235_v9 }
0x154b   :  { %v2564_v2 = vpop.eup %2563 }
0x154c   :  { %1212 = vrot.lane.b32.xlu1 %v2564_v2, %s2618_s21  ;;  %v2566_v10 = vpop.eup %2565  ;;  %v276_v2 = vpop.f32.mrb[31].mxu0 }
0x154d   :  { %320 = vst.msk [vmem:[#allocation3 + $0x40] sm:$0xff] %vm311_vm1, %v2566_v10 }
0x1554   :  { %v1226_v21 = vld [vmem:[#allocation3 + $0x40] sm:$0xff] }
0x15be   :  { %v1213_v5 = vpop.permute.xlu1 %1212 }
0x15bf   :  { %v1215_v6 = vmul.f32 %v1213_v5, %v1193_v56  ;;  %v259_v56 = vadd.f32 %v258_v54, %v2750_v34 }
0x15c1   :  { %1217 = vrot.lane.b32.xlu0 %v1215_v6, %s2619_s24  ;;  %v277_v6 = vadd.f32 %v276_v2, %v2750_v34 }
0x1633   :  { %v1218_v11 = vpop.permute.xlu0 %1217 }
0x1634   :  { %v1220_v12 = vsel %vm311_vm1, %v1218_v11, %v1209_v0  ;;  %2325 = vmatmul.mubr.msk.f32.vlgmr.msra.gmra.mrb[16].mxu1 %vm311_vm1, %v1218_v11  ;;  %v239_v11 = vadd.f32 %v238_v43, %v2748_v33 }
0x1635   :  { %2131 = vst.msk [vmem:[%s3214_s8 + $0x38] sm:$0xff] %vm458_vm3, %v1220_v12  ;;  %2478 = vmatpush3.bf16.msra.mxu1 %v2705_v18  ;;  %2346 = vmatprep.mubr.msk.f32.mxu1 %vm2617_vm0, %v2616_v4 }
0x1636   :  { %2479 = vmatprep.subr.bf16.mxu1 %v2615_v3 }
0x1639   :  { %2481 = vmatpush3.bf16.msra.mxu1 %v2720_v24 }
0x163a   :  { %2488 = vmatprep.subr.bf16.mxu1 %v2615_v3 }
0x1707   :  { %v1295_v14 = vpop.f32.mrb[16].mxu1 }
0x1708   :  { %v1299_v15 = vadd.f32 %v1295_v14, %v233_v13  ;;  %v2326_v16 = vpop.f32.mrb[17].mxu1 }
0x170a   :  { %2567 = vtanh.f32 %v1299_v15 }
0x1714   :  { %v2568_v17 = vpop.eup %2567 }
0x1715   :  { %v1301_v19 = vmul.f32 %v2568_v17, %v2757_v42 }
0x1717   :  { %v1302_v20 = vadd.f32 %v2763_v45, %v1301_v19 }
0x1719   :  { %1305 = vrot.lane.b32.xlu1 %v1302_v20, %s2618_s21  ;;  %v1303_v25 = vmul.f32 %v1302_v20, %v1209_v0  ;;  %v271_v0 = vadd.f32 %v270_v62, %v2750_v34 }
0x171d   :  { %1315 = vrot.lane.b32.xlu1 %v1226_v21, %s2619_s24 }
0x178b   :  { %v1306_v22 = vpop.permute.xlu1 %1305 }
0x178c   :  { %v1308_v23 = vmul.f32 %v1306_v22, %v1302_v20 }
0x178e   :  { %1310 = vrot.lane.b32.xlu0 %v1308_v23, %s2619_s24 }
0x178f   :  { %v1316_v28 = vpop.permute.xlu1 %1315 }
0x1800   :  { %v1311_v26 = vpop.permute.xlu0 %1310 }
0x1801   :  { %v1313_v27 = vadd.f32 %v1311_v26, %v1303_v25 }
0x1803   :  { %v2990_v29 = vadd.f32 %v1316_v28, %v1313_v27 }
0x1805   :  { %2569 = vtanh.f32 %v2990_v29 }
0x1806   :  { %2571 = vtanh.f32 %v241_v46 }
0x1807   :  { %2573 = vtanh.f32 %v247_v49 }
0x1808   :  { %2575 = vtanh.f32 %v253_v52 }
0x1809   :  { %2577 = vtanh.f32 %v259_v56 }
0x180a   :  { %2579 = vtanh.f32 %v265_v60 }
0x180b   :  { %2581 = vtanh.f32 %v271_v0  ;;  %v3117_v0 = vld [vmem:[%s3211_s4] ss:$0 sm:$0xff] }
0x180c   :  { %2583 = vtanh.f32 %v277_v6 }
0x180f   :  { %v2570_v35 = vpop.eup %2569 }
0x1810   :  { %1321 = vrot.lane.b32.xlu0 %v2570_v35, %s2618_s21  ;;  %v2572_v55 = vpop.eup %2571 }
0x1811   :  { %321 = vst.msk [vmem:[#allocation3 + $0x48] sm:$0xff] %vm311_vm1, %v2572_v55  ;;  %v2574_v59 = vpop.eup %2573 }
0x1812   :  { %322 = vst.msk [vmem:[#allocation3 + $0x50] sm:$0xff] %vm311_vm1, %v2574_v59  ;;  %v2576_v63 = vpop.eup %2575 }
0x1813   :  { %323 = vst.msk [vmem:[#allocation3 + $0x58] sm:$0xff] %vm311_vm1, %v2576_v63  ;;  %v2578_v5 = vpop.eup %2577 }
0x1814   :  { %324 = vst.msk [vmem:[#allocation3 + $0x60] sm:$0xff] %vm311_vm1, %v2578_v5  ;;  %v2580_v7 = vpop.eup %2579  ;;  %v3123_v5 = vld [vmem:[%s3212_s5] ss:$0 sm:$0xff] }
0x1815   :  { %325 = vst.msk [vmem:[#allocation3 + $0x68] sm:$0xff] %vm311_vm1, %v2580_v7  ;;  %v2582_v34 = vpop.eup %2581 }
0x1816   :  { %326 = vst.msk [vmem:[#allocation3 + $0x70] sm:$0xff] %vm311_vm1, %v2582_v34  ;;  %v2584_v10 = vpop.eup %2583 }
0x1817   :  { %327 = vst.msk [vmem:[#allocation3 + $0x78] sm:$0xff] %vm311_vm1, %v2584_v10 }
0x1818   :  { %v1335_v19 = vld [vmem:[#allocation3 + $0x48] sm:$0xff] }
0x1819   :  { %v1444_v43 = vld [vmem:[#allocation3 + $0x50] sm:$0xff] }
0x181a   :  { %v1553_v50 = vld [vmem:[#allocation3 + $0x58] sm:$0xff] }
0x1882   :  { %v1322_v40 = vpop.permute.xlu0 %1321 }
0x1883   :  { %v1324_v41 = vmul.f32 %v1322_v40, %v1302_v20 }
0x1885   :  { %1326 = vrot.lane.b32.xlu1 %v1324_v41, %s2619_s24 }
0x18f7   :  { %v1327_v8 = vpop.permute.xlu1 %1326 }
0x18f8   :  { %v1329_v9 = vsel %vm311_vm1, %v1327_v8, %v2990_v29  ;;  %2336 = vmatmul.mubr.msk.f32.vlgmr.msra.gmra.mrb[32].mxu0 %vm311_vm1, %v1327_v8 }
0x18f9   :  { %2133 = vst.msk [vmem:[%s3214_s8 + $0x40] sm:$0xff] %vm458_vm3, %v1329_v9  ;;  %2484 = vmatpush3.bf16.msra.mxu0 %v2705_v18  ;;  %2357 = vmatprep.mubr.msk.f32.mxu0 %vm2617_vm0, %v2616_v4 }
0x18fa   :  { %2485 = vmatprep.subr.bf16.mxu0 %v2615_v3 }
0x18fd   :  { %2487 = vmatpush3.bf16.msra.mxu0 %v2720_v24 }
0x18fe   :  { %2494 = vmatprep.subr.bf16.mxu0 %v2615_v3 }
0x19cb   :  { %v1404_v12 = vpop.f32.mrb[32].mxu0 }
0x19cc   :  { %v1408_v13 = vadd.f32 %v1404_v12, %v239_v11  ;;  %v2337_v14 = vpop.f32.mrb[33].mxu0 }
0x19ce   :  { %2585 = vtanh.f32 %v1408_v13 }
0x19d8   :  { %v2586_v15 = vpop.eup %2585 }
0x19d9   :  { %v1410_v16 = vmul.f32 %v2586_v15, %v2757_v42 }
0x19db   :  { %v1411_v17 = vadd.f32 %v2763_v45, %v1410_v16 }
0x19dd   :  { %1414 = vrot.lane.b32.xlu0 %v1411_v17, %s2618_s21  ;;  %v1412_v22 = vmul.f32 %v1411_v17, %v2990_v29  ;;  %v245_v29 = vadd.f32 %v3032_v47, %v2748_v33 }
0x19e1   :  { %1424 = vrot.lane.b32.xlu0 %v1335_v19, %s2619_s24  ;;  %v257_v19 = vadd.f32 %v3038_v53, %v2748_v33 }
0x1a4f   :  { %v1415_v20 = vpop.permute.xlu0 %1414 }
0x1a50   :  { %v1417_v21 = vmul.f32 %v1415_v20, %v1411_v17 }
0x1a52   :  { %1419 = vrot.lane.b32.xlu1 %v1417_v21, %s2619_s24 }
0x1a53   :  { %v1425_v26 = vpop.permute.xlu0 %1424 }
0x1ac4   :  { %v1420_v23 = vpop.permute.xlu1 %1419 }
0x1ac5   :  { %v1422_v25 = vadd.f32 %v1420_v23, %v1412_v22 }
0x1ac7   :  { %v1427_v27 = vadd.f32 %v1425_v26, %v1422_v25 }
0x1ac9   :  { %2587 = vtanh.f32 %v1427_v27 }
0x1ad3   :  { %v2588_v28 = vpop.eup %2587 }
0x1ad4   :  { %1430 = vrot.lane.b32.xlu1 %v2588_v28, %s2618_s21 }
0x1b46   :  { %v1431_v30 = vpop.permute.xlu1 %1430 }
0x1b47   :  { %v1433_v31 = vmul.f32 %v1431_v30, %v1411_v17 }
0x1b49   :  { %1435 = vrot.lane.b32.xlu0 %v1433_v31, %s2619_s24 }
0x1bbb   :  { %v1436_v32 = vpop.permute.xlu0 %1435 }
0x1bbc   :  { %v1438_v35 = vsel %vm311_vm1, %v1436_v32, %v1427_v27  ;;  %2347 = vmatmul.mubr.msk.f32.vlgmr.msra.gmra.mrb[18].mxu1 %vm311_vm1, %v1436_v32 }
0x1bbd   :  { %2135 = vst.msk [vmem:[%s3214_s8 + $0x48] sm:$0xff] %vm458_vm3, %v1438_v35  ;;  %2490 = vmatpush3.bf16.msra.mxu1 %v2705_v18  ;;  %2368 = vmatprep.mubr.msk.f32.mxu1 %vm2617_vm0, %v2616_v4 }
0x1bbe   :  { %2491 = vmatprep.subr.bf16.mxu1 %v2615_v3 }
0x1bc1   :  { %2493 = vmatpush3.bf16.msra.mxu1 %v2720_v24 }
0x1bc2   :  { %2500 = vmatprep.subr.bf16.mxu1 %v2615_v3 }
0x1c8f   :  { %v1513_v36 = vpop.f32.mrb[18].mxu1 }
0x1c90   :  { %v1517_v37 = vadd.f32 %v1513_v36, %v245_v29  ;;  %v2348_v38 = vpop.f32.mrb[19].mxu1 }
0x1c92   :  { %2589 = vtanh.f32 %v1517_v37 }
0x1c9c   :  { %v2590_v39 = vpop.eup %2589 }
0x1c9d   :  { %v1519_v40 = vmul.f32 %v2590_v39, %v2757_v42 }
0x1c9f   :  { %v1520_v41 = vadd.f32 %v2763_v45, %v1519_v40 }
0x1ca1   :  { %1523 = vrot.lane.b32.xlu1 %v1520_v41, %s2618_s21  ;;  %v1521_v48 = vmul.f32 %v1520_v41, %v1427_v27  ;;  %v1662_v27 = vld [vmem:[#allocation3 + $0x60] sm:$0xff] }
0x1ca5   :  { %1533 = vrot.lane.b32.xlu1 %v1444_v43, %s2619_s24 }
0x1d13   :  { %v1524_v44 = vpop.permute.xlu1 %1523 }
0x1d14   :  { %v1526_v46 = vmul.f32 %v1524_v44, %v1520_v41 }
0x1d16   :  { %1528 = vrot.lane.b32.xlu0 %v1526_v46, %s2619_s24 }
0x1d17   :  { %v1534_v51 = vpop.permute.xlu1 %1533 }
0x1d88   :  { %v1529_v47 = vpop.permute.xlu0 %1528 }
0x1d89   :  { %v1531_v49 = vadd.f32 %v1529_v47, %v1521_v48 }
0x1d8b   :  { %v1536_v52 = vadd.f32 %v1534_v51, %v1531_v49 }
0x1d8d   :  { %2591 = vtanh.f32 %v1536_v52 }
0x1d97   :  { %v2592_v54 = vpop.eup %2591 }
0x1d98   :  { %1539 = vrot.lane.b32.xlu0 %v2592_v54, %s2618_s21 }
0x1e0a   :  { %v1540_v42 = vpop.permute.xlu0 %1539 }
0x1e0b   :  { %v1542_v45 = vmul.f32 %v1540_v42, %v1520_v41  ;;  %v263_v41 = vadd.f32 %v3042_v57, %v2748_v33 }
0x1e0d   :  { %1544 = vrot.lane.b32.xlu1 %v1542_v45, %s2619_s24 }
0x1e7f   :  { %v1545_v55 = vpop.permute.xlu1 %1544 }
0x1e80   :  { %v1547_v56 = vsel %vm311_vm1, %v1545_v55, %v1536_v52  ;;  %2358 = vmatmul.mubr.msk.f32.vlgmr.msra.gmra.mrb[34].mxu0 %vm311_vm1, %v1545_v55 }
0x1e81   :  { %2137 = vst.msk [vmem:[%s3214_s8 + $0x50] sm:$0xff] %vm458_vm3, %v1547_v56  ;;  %2496 = vmatpush3.bf16.msra.mxu0 %v2705_v18  ;;  %2379 = vmatprep.mubr.msk.f32.mxu0 %vm2617_vm0, %v2616_v4 }
0x1e82   :  { %2497 = vmatprep.subr.bf16.mxu0 %v2615_v3 }
0x1e85   :  { %2499 = vmatpush3.bf16.msra.mxu0 %v2720_v24 }
0x1e86   :  { %2506 = vmatprep.subr.bf16.mxu0 %v2615_v3 }
0x1f53   :  { %v1622_v59 = vpop.f32.mrb[34].mxu0 }
0x1f54   :  { %v1626_v60 = vadd.f32 %v1622_v59, %v251_v58  ;;  %v2359_v62 = vpop.f32.mrb[35].mxu0  ;;  %v269_v59 = vadd.f32 %v3046_v61, %v2748_v33 }
0x1f56   :  { %2593 = vtanh.f32 %v1626_v60 }
0x1f60   :  { %v2594_v63 = vpop.eup %2593 }
0x1f61   :  { %v1628_v2 = vmul.f32 %v3117_v0, %v2594_v63 }
0x1f63   :  { %v1629_v6 = vadd.f32 %v3123_v5, %v1628_v2 }
0x1f65   :  { %1632 = vrot.lane.b32.xlu0 %v1629_v6, %s2618_s21  ;;  %v1630_v9 = vmul.f32 %v1629_v6, %v1536_v52 }
0x1f69   :  { %1642 = vrot.lane.b32.xlu0 %v1553_v50, %s2619_s24 }
0x1fd7   :  { %v1633_v7 = vpop.permute.xlu0 %1632 }
0x1fd8   :  { %v1635_v8 = vmul.f32 %v1633_v7, %v1629_v6  ;;  %v1880_v7 = vld [vmem:[#allocation3 + $0x70] sm:$0xff] }
0x1fda   :  { %1637 = vrot.lane.b32.xlu1 %v1635_v8, %s2619_s24 }
0x1fdb   :  { %v1643_v11 = vpop.permute.xlu0 %1642 }
0x204c   :  { %v1638_v34 = vpop.permute.xlu1 %1637 }
0x204d   :  { %v1640_v10 = vadd.f32 %v1638_v34, %v1630_v9 }
0x204f   :  { %v1645_v12 = vadd.f32 %v1643_v11, %v1640_v10 }
0x2051   :  { %2595 = vtanh.f32 %v1645_v12 }
0x205b   :  { %v2596_v13 = vpop.eup %2595 }
0x205c   :  { %1648 = vrot.lane.b32.xlu1 %v2596_v13, %s2618_s21 }
0x20ce   :  { %v1649_v14 = vpop.permute.xlu1 %1648 }
0x20cf   :  { %v1651_v15 = vmul.f32 %v1649_v14, %v1629_v6 }
0x20d1   :  { %1653 = vrot.lane.b32.xlu0 %v1651_v15, %s2619_s24 }
0x2143   :  { %v1654_v16 = vpop.permute.xlu0 %1653 }
0x2144   :  { %v1656_v17 = vsel %vm311_vm1, %v1654_v16, %v1645_v12  ;;  %2369 = vmatmul.mubr.msk.f32.vlgmr.msra.gmra.mrb[20].mxu1 %vm311_vm1, %v1654_v16 }
0x2145   :  { %2139 = vst.msk [vmem:[%s3214_s8 + $0x58] sm:$0xff] %vm458_vm3, %v1656_v17  ;;  %2502 = vmatpush3.bf16.msra.mxu1 %v2705_v18  ;;  %2390 = vmatprep.mubr.msk.f32.mxu1 %vm2617_vm0, %v2616_v4 }
0x2146   :  { %2503 = vmatprep.subr.bf16.mxu1 %v2615_v3 }
0x2149   :  { %2505 = vmatpush3.bf16.msra.mxu1 %v2720_v24 }
0x2217   :  { %v1731_v20 = vpop.f32.mrb[20].mxu1 }
0x2218   :  { %v1735_v21 = vadd.f32 %v1731_v20, %v257_v19  ;;  %v2370_v22 = vpop.f32.mrb[21].mxu1  ;;  %v275_v19 = vadd.f32 %v3050_v1, %v2748_v33 }
0x221a   :  { %2597 = vtanh.f32 %v1735_v21 }
0x2224   :  { %v2598_v23 = vpop.eup %2597 }
0x2225   :  { %v1737_v25 = vmul.f32 %v3117_v0, %v2598_v23 }
0x2227   :  { %v1738_v26 = vadd.f32 %v3123_v5, %v1737_v25 }
0x2229   :  { %1741 = vrot.lane.b32.xlu1 %v1738_v26, %s2618_s21  ;;  %v1739_v31 = vmul.f32 %v1738_v26, %v1645_v12 }
0x222d   :  { %1751 = vrot.lane.b32.xlu1 %v1662_v27, %s2619_s24  ;;  %v1989_v27 = vld [vmem:[#allocation3 + $0x78] sm:$0xff] }
0x229b   :  { %v1742_v28 = vpop.permute.xlu1 %1741 }
0x229c   :  { %v1744_v30 = vmul.f32 %v1742_v28, %v1738_v26 }
0x229e   :  { %1746 = vrot.lane.b32.xlu0 %v1744_v30, %s2619_s24 }
0x229f   :  { %v1752_v35 = vpop.permute.xlu1 %1751 }
0x2310   :  { %v1747_v53 = vpop.permute.xlu0 %1746 }
0x2311   :  { %v1749_v32 = vadd.f32 %v1747_v53, %v1739_v31 }
0x2313   :  { %v1754_v29 = vadd.f32 %v1752_v35, %v1749_v32 }
0x2315   :  { %2599 = vtanh.f32 %v1754_v29 }
0x231f   :  { %v2600_v36 = vpop.eup %2599 }
0x2320   :  { %1757 = vrot.lane.b32.xlu0 %v2600_v36, %s2618_s21 }
0x2392   :  { %v1758_v37 = vpop.permute.xlu0 %1757 }
0x2393   :  { %v1760_v38 = vmul.f32 %v1758_v37, %v1738_v26 }
0x2395   :  { %1762 = vrot.lane.b32.xlu1 %v1760_v38, %s2619_s24 }
0x2407   :  { %v1763_v39 = vpop.permute.xlu1 %1762 }
0x2408   :  { %v1765_v40 = vsel %vm311_vm1, %v1763_v39, %v1754_v29  ;;  %2380 = vmatmul.mubr.msk.f32.vlgmr.msra.gmra.mrb[36].mxu0 %vm311_vm1, %v1763_v39 }
0x2409   :  { %2141 = vst.msk [vmem:[%s3214_s8 + $0x60] sm:$0xff] %vm458_vm3, %v1765_v40  ;;  %2508 = vmatpush3.bf16.msra.mxu0 %v2705_v18  ;;  %2401 = vmatprep.mubr.msk.f32.mxu0 %vm2617_vm0, %v2616_v4  ;;  %v1771_v18 = vld [vmem:[#allocation3 + $0x68] sm:$0xff] }
0x240a   :  { %2509 = vmatprep.subr.bf16.mxu0 %v2615_v3 }
0x240d   :  { %2511 = vmatpush3.bf16.msra.mxu0 %v2720_v24 }
0x24db   :  { %v1840_v43 = vpop.f32.mrb[36].mxu0 }
0x24dc   :  { %v1844_v44 = vadd.f32 %v1840_v43, %v263_v41  ;;  %v2381_v46 = vpop.f32.mrb[37].mxu0 }
0x24de   :  { %2601 = vtanh.f32 %v1844_v44 }
0x24e8   :  { %v2602_v48 = vpop.eup %2601 }
0x24e9   :  { %v1846_v47 = vmul.f32 %v3117_v0, %v2602_v48 }
0x24eb   :  { %v1847_v49 = vadd.f32 %v3123_v5, %v1846_v47 }
0x24ed   :  { %1850 = vrot.lane.b32.xlu0 %v1847_v49, %s2618_s21  ;;  %v1848_v24 = vmul.f32 %v1847_v49, %v1754_v29 }
0x24f1   :  { %1860 = vrot.lane.b32.xlu0 %v1771_v18, %s2619_s24 }
0x255f   :  { %v1851_v3 = vpop.permute.xlu0 %1850 }
0x2560   :  { %v1853_v4 = vmul.f32 %v1851_v3, %v1847_v49 }
0x2562   :  { %1855 = vrot.lane.b32.xlu1 %v1853_v4, %s2619_s24 }
0x2563   :  { %v1861_v52 = vpop.permute.xlu0 %1860 }
0x25d4   :  { %v1856_v57 = vpop.permute.xlu1 %1855 }
0x25d5   :  { %v1858_v51 = vadd.f32 %v1856_v57, %v1848_v24 }
0x25d7   :  { %v1863_v54 = vadd.f32 %v1861_v52, %v1858_v51 }
0x25d9   :  { %2603 = vtanh.f32 %v1863_v54 }
0x25e3   :  { %v2604_v42 = vpop.eup %2603 }
0x25e4   :  { %1866 = vrot.lane.b32.xlu1 %v2604_v42, %s2618_s21 }
0x2656   :  { %v1867_v45 = vpop.permute.xlu1 %1866 }
0x2657   :  { %v1869_v55 = vmul.f32 %v1867_v45, %v1847_v49 }
0x2659   :  { %1871 = vrot.lane.b32.xlu0 %v1869_v55, %s2619_s24 }
0x26cb   :  { %v1872_v56 = vpop.permute.xlu0 %1871 }
0x26cc   :  { %v1874_v58 = vsel %vm311_vm1, %v1872_v56, %v1863_v54  ;;  %2391 = vmatmul.mubr.msk.f32.vlgmr.msra.gmra.mrb[22].mxu1 %vm311_vm1, %v1872_v56 }
0x26cd   :  { %2143 = vst.msk [vmem:[%s3214_s8 + $0x68] sm:$0xff] %vm458_vm3, %v1874_v58 }
0x279f   :  { %v1949_v60 = vpop.f32.mrb[22].mxu1 }
0x27a0   :  { %v1953_v62 = vadd.f32 %v1949_v60, %v269_v59  ;;  %v2392_v63 = vpop.f32.mrb[23].mxu1 }
0x27a2   :  { %2605 = vtanh.f32 %v1953_v62 }
0x27ac   :  { %v2606_v2 = vpop.eup %2605 }
0x27ad   :  { %v1955_v6 = vmul.f32 %v3117_v0, %v2606_v2 }
0x27af   :  { %v1956_v50 = vadd.f32 %v3123_v5, %v1955_v6 }
0x27b1   :  { %1959 = vrot.lane.b32.xlu1 %v1956_v50, %s2618_s21  ;;  %v1957_v34 = vmul.f32 %v1956_v50, %v1863_v54 }
0x27b5   :  { %1969 = vrot.lane.b32.xlu1 %v1880_v7, %s2619_s24 }
0x2823   :  { %v1960_v8 = vpop.permute.xlu1 %1959 }
0x2824   :  { %v1962_v9 = vmul.f32 %v1960_v8, %v1956_v50 }
0x2826   :  { %1964 = vrot.lane.b32.xlu0 %v1962_v9, %s2619_s24 }
0x2827   :  { %v1970_v11 = vpop.permute.xlu1 %1969 }
0x2898   :  { %v1965_v61 = vpop.permute.xlu0 %1964 }
0x2899   :  { %v1967_v10 = vadd.f32 %v1965_v61, %v1957_v34 }
0x289b   :  { %v1972_v12 = vadd.f32 %v1970_v11, %v1967_v10 }
0x289d   :  { %2607 = vtanh.f32 %v1972_v12 }
0x28a7   :  { %v2608_v13 = vpop.eup %2607 }
0x28a8   :  { %1975 = vrot.lane.b32.xlu0 %v2608_v13, %s2618_s21 }
0x291a   :  { %v1976_v14 = vpop.permute.xlu0 %1975 }
0x291b   :  { %v1978_v15 = vmul.f32 %v1976_v14, %v1956_v50 }
0x291d   :  { %1980 = vrot.lane.b32.xlu1 %v1978_v15, %s2619_s24 }
0x298f   :  { %v1981_v16 = vpop.permute.xlu1 %1980 }
0x2990   :  { %v1983_v17 = vsel %vm311_vm1, %v1981_v16, %v1972_v12  ;;  %2402 = vmatmul.mubr.msk.f32.vlgmr.msra.gmra.mrb[38].mxu0 %vm311_vm1, %v1981_v16 }
0x2991   :  { %2145 = vst.msk [vmem:[%s3214_s8 + $0x70] sm:$0xff] %vm458_vm3, %v1983_v17 }
0x2a63   :  { %v2058_v20 = vpop.f32.mrb[38].mxu0 }
0x2a64   :  { %v2062_v21 = vadd.f32 %v2058_v20, %v275_v19  ;;  %v2403_v22 = vpop.f32.mrb[39].mxu0 }
0x2a66   :  { %2609 = vtanh.f32 %v2062_v21 }
0x2a70   :  { %v2610_v23 = vpop.eup %2609 }
0x2a71   :  { %v2064_v25 = vmul.f32 %v3117_v0, %v2610_v23 }
0x2a73   :  { %v2065_v26 = vadd.f32 %v3123_v5, %v2064_v25 }
0x2a75   :  { %2068 = vrot.lane.b32.xlu0 %v2065_v26, %s2618_s21  ;;  %v2066_v31 = vmul.f32 %v2065_v26, %v1972_v12 }
0x2a79   :  { %2078 = vrot.lane.b32.xlu0 %v1989_v27, %s2619_s24 }
0x2ae7   :  { %v2069_v28 = vpop.permute.xlu0 %2068 }
0x2ae8   :  { %v2071_v30 = vmul.f32 %v2069_v28, %v2065_v26 }
0x2aea   :  { %2073 = vrot.lane.b32.xlu1 %v2071_v30, %s2619_s24 }
0x2aeb   :  { %v2079_v53 = vpop.permute.xlu0 %2078 }
0x2b5c   :  { %v2074_v33 = vpop.permute.xlu1 %2073 }
0x2b5d   :  { %v2076_v1 = vadd.f32 %v2074_v33, %v2066_v31 }
0x2b5f   :  { %v2081_v32 = vadd.f32 %v2079_v53, %v2076_v1 }
0x2b61   :  { %2611 = vtanh.f32 %v2081_v32 }
0x2b6b   :  { %v2612_v35 = vpop.eup %2611 }
0x2b6c   :  { %2084 = vrot.lane.b32.xlu1 %v2612_v35, %s2618_s21 }
0x2bde   :  { %v2085_v0 = vpop.permute.xlu1 %2084 }
0x2bdf   :  { %v2087_v5 = vmul.f32 %v2085_v0, %v2065_v26 }
0x2be1   :  { %2089 = vrot.lane.b32.xlu0 %v2087_v5, %s2619_s24 }
0x2c53   :  { %v2090_v29 = vpop.permute.xlu0 %2089 }
0x2c54   :  { %v2092_v36 = vsel %vm311_vm1, %v2090_v29, %v2081_v32 }
0x2c55   :  { %2147 = vst.msk [vmem:[%s3214_s8 + $0x78] sm:$0xff] %vm458_vm3, %v2092_v36 }

</bundles_post_ra>
